<compile_context>
chip_gen: v7x
topology: tpu7x:2x2x1
jax: 0.10.0
libtpu: 0.0.40
codegen_flags: <defaults>
</compile_context>

<pallas_src>
import jax
import jax.numpy as jnp
import numpy as np
from jax import lax
from jax.experimental import pallas as pl
from jax.experimental.pallas import tpu as pltpu


def gcn_kernel(adj_ref, x_ref, w1_ref, b1_ref, w2_ref, b2_ref, out_ref):
    bb, E, N, _ = adj_ref.shape                           # static block shape
    F_in = x_ref.shape[-1]
    H2 = w2_ref.shape[1]

    adj = adj_ref[...]                                    # (bb, E, N, N)
    x = x_ref[...]                                        # (bb, N, F_in)

    # Row-normalize each edge-type adjacency: D^{-1} A with D = rowsum(A + I).
    # One exact reciprocal per row + a VPU multiply instead of N divides per row.
    deg = jnp.sum(adj, axis=-1, keepdims=True) + 1.0      # (bb, E, N, 1)
    rdeg = pl.reciprocal(deg, approx=False)               # exact: keeps rtol=1e-4 safe
    adj_n = adj * rdeg                                    # (bb, E, N, N)

    # sum_e (A_e @ H) == (sum_e A_e) @ H, and the residual "+ H" folds into the
    # same operator via the identity: a_prop = sum_e D^{-1}A_e + I.
    a_sum = jnp.sum(adj_n, axis=1)                        # (bb, N, N)
    eye = (lax.broadcasted_iota(jnp.int32, (N, N), 0) ==
           lax.broadcasted_iota(jnp.int32, (N, N), 1)).astype(a_sum.dtype)
    a_prop = a_sum + eye[None]                            # (bb, N, N)

    # Layer 1: flatten (bb, N) into the matmul M dim -> one fat MXU push.
    h1 = jnp.dot(x.reshape(bb * N, F_in), w1_ref[...],
                 preferred_element_type=jnp.float32,
                 precision=lax.Precision.HIGHEST) + b1_ref[...]
    hidden = jnp.tanh(
        jnp.einsum('bij,bjk->bik', a_prop, h1.reshape(bb, N, -1),
                   preferred_element_type=jnp.float32,
                   precision=lax.Precision.HIGHEST))

    # Layer 2
    h2 = jnp.dot(hidden.reshape(bb * N, -1), w2_ref[...],
                 preferred_element_type=jnp.float32,
                 precision=lax.Precision.HIGHEST) + b2_ref[...]
    out = jnp.tanh(
        jnp.einsum('bij,bjk->bik', a_prop, h2.reshape(bb, N, H2),
                   preferred_element_type=jnp.float32,
                   precision=lax.Precision.HIGHEST))

    out_ref[...] = out.astype(out_ref.dtype)


_VMEM_LIMIT_BYTES = 32 << 20      # explicit scoped-VMEM cap (safe on v5e/v6e/v7x)
_VMEM_BLOCK_BUDGET = 20 << 20     # what one grid step may consume (with headroom)


def _pick_batch_block(B, E, N, F_in, H1, H2, budget=_VMEM_BLOCK_BUDGET):
    """Largest divisor of B whose per-step VMEM footprint fits the budget."""
    def est(bb):
        adj_blk = bb * E * N * N * 4
        x_blk = bb * N * F_in * 4
        out_blk = bb * N * H2 * 4
        # double-buffered I/O blocks + in-kernel temporaries
        # (adj_n ~ adj, a_prop ~ bb*N*N, h1/hidden/h2/out ~ 4*bb*N*max(H1,H2))
        interm = adj_blk + bb * N * N * 4 + 4 * bb * N * max(H1, H2) * 4
        return 2 * (adj_blk + x_blk + out_blk) + interm

    for bb in sorted((d for d in range(1, B + 1) if B % d == 0), reverse=True):
        if est(bb) <= budget:
            return bb
    return 1


def graph_convolution(x, adj, w1, b1, w2, b2, batch_block=None):
    B, E, N, _ = adj.shape
    F_in = x.shape[-1]
    H1 = w1.shape[1]
    H2 = w2.shape[1]

    if batch_block is None:
        batch_block = _pick_batch_block(B, E, N, F_in, H1, H2)
    assert B % batch_block == 0, "batch_block must divide B"
    num_blocks = B // batch_block

    return pl.pallas_call(
        gcn_kernel,
        out_shape=jax.ShapeDtypeStruct((B, N, H2), jnp.float32),
        grid=(num_blocks,),
        in_specs=[
            pl.BlockSpec((batch_block, E, N, N), lambda b: (b, 0, 0, 0)),
            pl.BlockSpec((batch_block, N, F_in), lambda b: (b, 0, 0)),
            pl.BlockSpec((F_in, H1), lambda b: (0, 0)),   # constant maps: weights
            pl.BlockSpec((1, H1), lambda b: (0, 0)),      # stay VMEM-resident
            pl.BlockSpec((H1, H2), lambda b: (0, 0)),
            pl.BlockSpec((1, H2), lambda b: (0, 0)),
        ],
        out_specs=pl.BlockSpec((batch_block, N, H2), lambda b: (b, 0, 0)),
        compiler_params=pltpu.CompilerParams(
            dimension_semantics=("arbitrary",),
            vmem_limit_bytes=_VMEM_LIMIT_BYTES),
    )(adj, x, w1, b1, w2, b2)


def reference(x, adj, w1, b1, w2, b2):
    # Pure-JAX reproduction of the PyTorch forward (eval mode).
    N = adj.shape[2]
    deg = jnp.sum(adj + jnp.eye(N, dtype=adj.dtype), axis=3)        # (B,E,N)
    adj_n = adj / deg[..., None]                                    # D^{-1} A
    h1 = x @ w1 + b1                                                # (B,N,H1)
    hidden = jnp.einsum('beij,bjk->beik', adj_n, h1)
    hidden = jnp.tanh(jnp.sum(hidden, axis=1) + h1)
    h2 = hidden @ w2 + b2
    out = jnp.einsum('beij,bjk->beik', adj_n, h2)
    out = jnp.tanh(jnp.sum(out, axis=1) + h2)
    return out


if __name__ == "__main__":
    # Module config: in_features=8, out_feature_list=[32, 32], b_dim=E=4, dropout=0.0
    B, E, N = 4, 4, 16
    F_in, H1, H2 = 8, 32, 32

    key = jax.random.PRNGKey(0)
    k_x, k_a, k_w1, k_b1, k_w2, k_b2 = jax.random.split(key, 6)

    x = jax.random.normal(k_x, (B, N, F_in), dtype=jnp.float32)
    # Non-negative "adjacency" values (edge-type scores), as produced upstream.
    adj = jax.random.uniform(k_a, (B, E, N, N), dtype=jnp.float32)

    # Deterministic nn.Linear-style init: U(-1/sqrt(fan_in), 1/sqrt(fan_in)).
    lim1 = 1.0 / np.sqrt(F_in)
    lim2 = 1.0 / np.sqrt(H1)
    w1 = jax.random.uniform(k_w1, (F_in, H1), minval=-lim1, maxval=lim1, dtype=jnp.float32)
    b1 = jax.random.uniform(k_b1, (1, H1), minval=-lim1, maxval=lim1, dtype=jnp.float32)
    w2 = jax.random.uniform(k_w2, (H1, H2), minval=-lim2, maxval=lim2, dtype=jnp.float32)
    b2 = jax.random.uniform(k_b2, (1, H2), minval=-lim2, maxval=lim2, dtype=jnp.float32)

    out = graph_convolution(x, adj, w1, b1, w2, b2)
    out = jax.block_until_ready(out)

    ref = jax.block_until_ready(reference(x, adj, w1, b1, w2, b2))
    np.testing.assert_allclose(np.asarray(out), np.asarray(ref), rtol=1e-4, atol=1e-4)

    print("KERNEL_OK")
</pallas_src>

<mosaic_0001>
module attributes {stable_mosaic.version = 11 : i64} {
  func.func @gcn_kernel(%arg0: i32, %arg1: memref<4x4x16x16xf32, #tpu.memory_space<vmem>>, %arg2: memref<4x16x8xf32, #tpu.memory_space<vmem>>, %arg3: memref<8x32xf32, #tpu.memory_space<vmem>>, %arg4: memref<1x32xf32, #tpu.memory_space<vmem>>, %arg5: memref<32x32xf32, #tpu.memory_space<vmem>>, %arg6: memref<1x32xf32, #tpu.memory_space<vmem>>, %arg7: memref<4x16x32xf32, #tpu.memory_space<vmem>>) attributes {dimension_semantics = [#tpu.dimension_semantics<arbitrary>], iteration_bounds = array<i64: 1>, scalar_prefetch = 0 : i64, scratch_operands = 0 : i64, tpu.core_type = #tpu.core_type<tc>, window_params = [{transform_indices = @transform_0, window_bounds = array<i64: 4, 4, 16, 16>}, {transform_indices = @transform_1, window_bounds = array<i64: 4, 16, 8>}, {pipeline_mode = #tpu.pipeline_mode<synchronous>, transform_indices = @transform_2, window_bounds = array<i64: 8, 32>}, {pipeline_mode = #tpu.pipeline_mode<synchronous>, transform_indices = @transform_3, window_bounds = array<i64: 1, 32>}, {pipeline_mode = #tpu.pipeline_mode<synchronous>, transform_indices = @transform_4, window_bounds = array<i64: 32, 32>}, {pipeline_mode = #tpu.pipeline_mode<synchronous>, transform_indices = @transform_5, window_bounds = array<i64: 1, 32>}, {transform_indices = @transform_6, window_bounds = array<i64: 4, 16, 32>}]} {
    %c0 = arith.constant 0 : index
    %c0_0 = arith.constant 0 : index
    %c0_1 = arith.constant 0 : index
    %c0_2 = arith.constant 0 : index
    %0 = vector.load %arg1[%c0, %c0_0, %c0_1, %c0_2] : memref<4x4x16x16xf32, #tpu.memory_space<vmem>>, vector<4x4x16x16xf32>
    %c0_3 = arith.constant 0 : index
    %c0_4 = arith.constant 0 : index
    %c0_5 = arith.constant 0 : index
    %1 = vector.load %arg2[%c0_3, %c0_4, %c0_5] : memref<4x16x8xf32, #tpu.memory_space<vmem>>, vector<4x16x8xf32>
    %cst = arith.constant dense<0.000000e+00> : vector<4x4x16xf32>
    %2 = vector.multi_reduction <add>, %0, %cst [3] : vector<4x4x16x16xf32> to vector<4x4x16xf32>
    %3 = vector.shape_cast %2 : vector<4x4x16xf32> to vector<4x4x16x1xf32>
    %cst_6 = arith.constant 1.000000e+00 : f32
    %4 = vector.broadcast %cst_6 : f32 to vector<4x4x16x1xf32>
    %5 = arith.addf %3, %4 : vector<4x4x16x1xf32>
    %6 = tpu.reciprocal %5 : vector<4x4x16x1xf32> -> vector<4x4x16x1xf32>
    %7 = vector.broadcast %6 : vector<4x4x16x1xf32> to vector<4x4x16x16xf32>
    %8 = arith.mulf %0, %7 : vector<4x4x16x16xf32>
    %cst_7 = arith.constant dense<0.000000e+00> : vector<4x16x16xf32>
    %9 = vector.multi_reduction <add>, %8, %cst_7 [1] : vector<4x4x16x16xf32> to vector<4x16x16xf32>
    %10 = tpu.iota {dimensions = array<i32: 0>} : vector<16x16xi32>
    %11 = tpu.iota {dimensions = array<i32: 1>} : vector<16x16xi32>
    %12 = arith.cmpi eq, %10, %11 : vector<16x16xi32>
    %13 = arith.extui %12 : vector<16x16xi1> to vector<16x16xi32>
    %14 = arith.sitofp %13 : vector<16x16xi32> to vector<16x16xf32>
    %15 = vector.shape_cast %14 : vector<16x16xf32> to vector<1x16x16xf32>
    %16 = vector.broadcast %15 : vector<1x16x16xf32> to vector<4x16x16xf32>
    %17 = arith.addf %9, %16 : vector<4x16x16xf32>
    %18 = vector.shape_cast %1 : vector<4x16x8xf32> to vector<64x8xf32>
    %c0_8 = arith.constant 0 : index
    %c0_9 = arith.constant 0 : index
    %19 = vector.load %arg3[%c0_8, %c0_9] : memref<8x32xf32, #tpu.memory_space<vmem>>, vector<8x32xf32>
    %cst_10 = arith.constant dense<0.000000e+00> : vector<64x32xf32>
    %20 = tpu.matmul %18, %19, %cst_10 {dimension_numbers = #tpu.dot_dimension_numbers<[1], [0], [0], [1], [0, 0, 1, 1], [], []>, precision = #tpu.contract_precision<fp32>} : vector<64x8xf32>, vector<8x32xf32>, vector<64x32xf32> -> vector<64x32xf32>
    %c0_11 = arith.constant 0 : index
    %c0_12 = arith.constant 0 : index
    %21 = vector.load %arg4[%c0_11, %c0_12] : memref<1x32xf32, #tpu.memory_space<vmem>>, vector<1x32xf32>
    %22 = vector.broadcast %21 : vector<1x32xf32> to vector<64x32xf32>
    %23 = arith.addf %20, %22 : vector<64x32xf32>
    %24 = vector.shape_cast %23 : vector<64x32xf32> to vector<4x16x32xf32>
    "tpu.trace_start"() <{level = 10 : i32, message = "bij,bjk->bik"}> : () -> ()
    %cst_13 = arith.constant dense<0.000000e+00> : vector<4x16x32xf32>
    %25 = tpu.matmul %17, %24, %cst_13 {dimension_numbers = #tpu.dot_dimension_numbers<[2], [1], [1], [2], [0, 0, 0, 1, 1, 2], [0], [0]>, precision = #tpu.contract_precision<fp32>} : vector<4x16x16xf32>, vector<4x16x32xf32>, vector<4x16x32xf32> -> vector<4x16x32xf32>
    "tpu.trace_stop"() : () -> ()
    %26 = math.tanh %25 : vector<4x16x32xf32>
    %27 = vector.shape_cast %26 : vector<4x16x32xf32> to vector<64x32xf32>
    %c0_14 = arith.constant 0 : index
    %c0_15 = arith.constant 0 : index
    %28 = vector.load %arg5[%c0_14, %c0_15] : memref<32x32xf32, #tpu.memory_space<vmem>>, vector<32x32xf32>
    %cst_16 = arith.constant dense<0.000000e+00> : vector<64x32xf32>
    %29 = tpu.matmul %27, %28, %cst_16 {dimension_numbers = #tpu.dot_dimension_numbers<[1], [0], [0], [1], [0, 0, 1, 1], [], []>, precision = #tpu.contract_precision<fp32>} : vector<64x32xf32>, vector<32x32xf32>, vector<64x32xf32> -> vector<64x32xf32>
    %c0_17 = arith.constant 0 : index
    %c0_18 = arith.constant 0 : index
    %30 = vector.load %arg6[%c0_17, %c0_18] : memref<1x32xf32, #tpu.memory_space<vmem>>, vector<1x32xf32>
    %31 = vector.broadcast %30 : vector<1x32xf32> to vector<64x32xf32>
    %32 = arith.addf %29, %31 : vector<64x32xf32>
    %33 = vector.shape_cast %32 : vector<64x32xf32> to vector<4x16x32xf32>
    "tpu.trace_start"() <{level = 10 : i32, message = "bij,bjk->bik"}> : () -> ()
    %cst_19 = arith.constant dense<0.000000e+00> : vector<4x16x32xf32>
    %34 = tpu.matmul %17, %33, %cst_19 {dimension_numbers = #tpu.dot_dimension_numbers<[2], [1], [1], [2], [0, 0, 0, 1, 1, 2], [0], [0]>, precision = #tpu.contract_precision<fp32>} : vector<4x16x16xf32>, vector<4x16x32xf32>, vector<4x16x32xf32> -> vector<4x16x32xf32>
    "tpu.trace_stop"() : () -> ()
    %35 = math.tanh %34 : vector<4x16x32xf32>
    %c0_20 = arith.constant 0 : index
    %c0_21 = arith.constant 0 : index
    %c0_22 = arith.constant 0 : index
    %36 = vector.load %arg7[%c0_20, %c0_21, %c0_22] : memref<4x16x32xf32, #tpu.memory_space<vmem>>, vector<4x16x32xf32>
    tpu.vector_store %arg7[%c0_20, %c0_21, %c0_22], %35 {strides = array<i32>} : memref<4x16x32xf32, #tpu.memory_space<vmem>>, vector<4x16x32xf32>,
    return
  }
  func.func @transform_0(%arg0: i32) -> (i32, i32, i32, i32) {
    %c0_i32 = arith.constant 0 : i32
    %c0_i32_0 = arith.constant 0 : i32
    %c0_i32_1 = arith.constant 0 : i32
    %c0_i32_2 = arith.constant 0 : i32
    return %arg0, %c0_i32, %c0_i32_0, %c0_i32_1 : i32, i32, i32, i32
  }
  func.func @transform_1(%arg0: i32) -> (i32, i32, i32) {
    %c0_i32 = arith.constant 0 : i32
    %c0_i32_0 = arith.constant 0 : i32
    %c0_i32_1 = arith.constant 0 : i32
    return %arg0, %c0_i32, %c0_i32_0 : i32, i32, i32
  }
  func.func @transform_2(%arg0: i32) -> (i32, i32) {
    %c0_i32 = arith.constant 0 : i32
    %c0_i32_0 = arith.constant 0 : i32
    %c0_i32_1 = arith.constant 0 : i32
    return %c0_i32, %c0_i32_0 : i32, i32
  }
  func.func @transform_3(%arg0: i32) -> (i32, i32) {
    %c0_i32 = arith.constant 0 : i32
    %c0_i32_0 = arith.constant 0 : i32
    %c0_i32_1 = arith.constant 0 : i32
    return %c0_i32, %c0_i32_0 : i32, i32
  }
  func.func @transform_4(%arg0: i32) -> (i32, i32) {
    %c0_i32 = arith.constant 0 : i32
    %c0_i32_0 = arith.constant 0 : i32
    %c0_i32_1 = arith.constant 0 : i32
    return %c0_i32, %c0_i32_0 : i32, i32
  }
  func.func @transform_5(%arg0: i32) -> (i32, i32) {
    %c0_i32 = arith.constant 0 : i32
    %c0_i32_0 = arith.constant 0 : i32
    %c0_i32_1 = arith.constant 0 : i32
    return %c0_i32, %c0_i32_0 : i32, i32
  }
  func.func @transform_6(%arg0: i32) -> (i32, i32, i32) {
    %c0_i32 = arith.constant 0 : i32
    %c0_i32_0 = arith.constant 0 : i32
    %c0_i32_1 = arith.constant 0 : i32
    return %arg0, %c0_i32, %c0_i32_0 : i32, i32, i32
  }
}

</mosaic_0001>

<bundles_post_ra>
// kernel: tpu_custom_call.1
= control target key start
LH: loop header
LB: loop body
LE: loop exit
PB: predicated region body
PF: predicated region fallthrough
CT: control target
= control target key end

     0   :  { %11 = vsyncpa [#allocation3], 0  ;;  %s8416_s0 = inlined_call_operand.hbm [shape: f32[4,4,16,16], index: 0, kind: input, shape index: {}]   ;;  %s8417_s1 = inlined_call_operand.vmem [shape: f32[4,16,8], index: 1, kind: input, shape index: {}]   ;;  %s8418_s2 = inlined_call_operand.vmem [shape: f32[8,32], index: 2, kind: input, shape index: {}]   ;;  %s8419_s3 = inlined_call_operand.vmem [shape: f32[1,32], index: 3, kind: input, shape index: {}]   ;;  %s8420_s4 = inlined_call_operand.vmem [shape: f32[32,32], index: 4, kind: input, shape index: {}]   ;;  %s8421_s5 = inlined_call_operand.vmem [shape: f32[1,32], index: 5, kind: input, shape index: {}]   ;;  %s8422_s6 = inlined_call_operand.hbm [shape: f32[4,16,32], index: 6, kind: output, shape index: {}]  }
   0x1   :  { %12 = vsyncpa [#allocation4], 0  ;;  %s7456_s21 = smov [#allocation2]   ;;  %s7408_s25 = scalar_lea.hbm %s8416_s0, 4096 }
   0x2   :  { %s18_s22 = sshll.u32 %s7456_s21, 4  ;;  %p7409_p0 = scmp.ne.s32.totalorder %s8416_s0, %s7408_s25  ;;  %s19_s22 = int_to_ptr.vmem [resolvable:$true] %s18_s22 }
   0x3   :  { %p7412_p1 = scmp.lt.u32.totalorder %s7408_s25, %s8416_s0 }
   0x5   :  { %p7414_p2 = pnand %p7412_p1, %p7409_p0 }
   0x7   :  { %7417 = shalt.err (!%p7414_p2)
}
   0x8   :  { %s7418_s30 = scalar_lea.vmem %s19_s22, 4096  ;;  %p7423_p4 = scmp.lt.s32.totalorder %s19_s22, %s19_s22 }
   0x9   :  { %p7419_p3 = scmp.ne.s32.totalorder %s19_s22, %s7418_s30  ;;  %p7424_p5 = scmp.lt.s32.totalorder %s7418_s30, %s7418_s30 }
   0xb   :  { %p7425_p6 = por %p7424_p5, %p7423_p4 }
   0xd   :  { %p7426_p7 = pnand %p7425_p6, %p7419_p3 }
   0xf   :  { %7429 = shalt.err (!%p7426_p7)
}
  0x10   :  { %s7457_s7 = smov 128   ;;  %s7458_s8 = smov 8  }
  0x11   :  { %24 = dma.hbm_to_vmem [thread:$0]  %s8416_s0, 4096, %s19_s22, [#allocation3], %s7457_s7, %s7457_s7, %s7458_s8  }
  0x12   :  { %7452 = dma.done.wait [#allocation3], 4096  }
  0x13   :  { %7453 = vsyncadd [#allocation3], 4294963200  ;;  %vm354_vm0 = vcmask 64512   ;;  %v346_v0 = vld [vmem:[%s8418_s2] sm:$0xff]  ;;  %v71_v2 = vld [vmem:[%s8417_s1 + $0x8] sm:$0xff]  ;;  %vm78_vm1 = vcmask 130048  }
  0x14   :  { %v70_v1 = vld [vmem:[%s8417_s1] sm:$0xff]  ;;  %v7520_v3 = vand.u32 4294901760, %v346_v0  ;;  %v359_v5 = vsel %vm354_vm0, %v71_v2, 0  ;;  %v72_v6 = vld [vmem:[%s8417_s1 + $0x10] sm:$0xff]  ;;  %v73_v7 = vld [vmem:[%s8417_s1 + $0x18] sm:$0xff]  ;;  %vm3177_vm4 = vcmask 261120  }
  0x15   :  { %v356_v4 = vsel %vm354_vm0, %v70_v1, 0  ;;  %v74_v8 = vld [vmem:[%s8417_s1 + $0x20] sm:$0xff]  ;;  %v7535_v10 = vand.u32 4294901760, %v359_v5  ;;  %v362_v11 = vsel %vm354_vm0, %v72_v6, 0  ;;  %v365_v12 = vsel %vm354_vm0, %v73_v7, 0  ;;  %v75_v13 = vld [vmem:[%s8417_s1 + $0x28] sm:$0xff] }
  0x16   :  { %v7533_v9 = vand.u32 4294901760, %v356_v4  ;;  %6351 = vmatprep.subr.mxu0 %v7520_v3  ;;  %v7543_v14 = vand.u32 4294901760, %v362_v11  ;;  %v7545_v15 = vand.u32 4294901760, %v365_v12  ;;  %v7548_v16 = vsub.f32 %v346_v0, %v7520_v3  ;;  %v76_v18 = vld [vmem:[%s8417_s1 + $0x30] sm:$0xff]  ;;  %v77_v39 = vld [vmem:[%s8417_s1 + $0x38] sm:$0xff]  ;;  %v7607_v44 = vld [vmem:[#allocation2] sm:$0xff] }
  0x17   :  { %v368_v17 = vsel %vm354_vm0, %v74_v8, 0  ;;  %6352 = vmatpush3.msra.mxu0 %v7520_v3  ;;  %v7559_v20 = vsub.f32 %v359_v5, %v7535_v10  ;;  %v371_v22 = vsel %vm354_vm0, %v75_v13, 0  ;;  %v374_v30 = vsel %vm354_vm0, %v76_v18, 0  ;;  %v7615_v49 = vld [vmem:[#allocation2 + $0x8] sm:$0xff]  ;;  %v7618_v52 = vld [vmem:[#allocation2 + $0x10] sm:$0xff]  ;;  %v7630_v59 = vld [vmem:[#allocation2 + $0x18] sm:$0xff] }
  0x18   :  { %v7556_v19 = vsub.f32 %v356_v4, %v7533_v9  ;;  %v7561_v21 = vand.u32 4294901760, %v368_v17  ;;  %v7565_v23 = vsub.f32 %v362_v11, %v7543_v14  ;;  %v7568_v24 = vsub.f32 %v365_v12, %v7545_v15  ;;  %v7641_v0 = vld [vmem:[#allocation2 + $0x20] sm:$0xff]  ;;  %v7646_v5 = vld [vmem:[#allocation2 + $0x28] sm:$0xff]  ;;  %v7653_v11 = vld [vmem:[#allocation2 + $0x30] sm:$0xff] }
  0x19   :  { %v7571_v25 = vand.u32 4294901760, %v7548_v16  ;;  %v7573_v26 = vand.u32 4294901760, %v371_v22  ;;  %v457_v28 = vand.u32 4294901760, %v7559_v20  ;;  %v7595_v38 = vand.u32 4294901760, %v374_v30 }
  0x1a   :  { %v447_v27 = vand.u32 4294901760, %v7556_v19  ;;  %v7578_v29 = vsub.f32 %v368_v17, %v7561_v21  ;;  %v467_v31 = vand.u32 4294901760, %v7565_v23  ;;  %v477_v32 = vand.u32 4294901760, %v7568_v24  ;;  %v7657_v17 = vld [vmem:[#allocation2 + $0x38] sm:$0xff] }
  0x1b   :  { %v529_v33 = vsub.f32 %v7548_v16, %v7571_v25  ;;  %v7586_v34 = vsub.f32 %v371_v22, %v7573_v26  ;;  %v458_v36 = vsub.f32 %v7559_v20, %v457_v28  ;;  %v7613_v48 = vsub.f32 %v374_v30, %v7595_v38  ;;  %v7661_v22 = vld [vmem:[#allocation2 + $0x40] sm:$0xff] }
  0x1c   :  { %v448_v35 = vsub.f32 %v7556_v19, %v447_v27  ;;  %v487_v37 = vand.u32 4294901760, %v7578_v29  ;;  %v468_v40 = vsub.f32 %v7565_v23, %v467_v31  ;;  %v478_v41 = vsub.f32 %v7568_v24, %v477_v32 }
  0x1d   :  { %v530_v42 = vand.u32 4294901760, %v529_v33  ;;  %v497_v43 = vand.u32 4294901760, %v7586_v34  ;;  %v459_v46 = vand.u32 4294901760, %v458_v36  ;;  %v377_v51 = vsel %vm354_vm0, %v77_v39, 0  ;;  %v7665_v33 = vld [vmem:[#allocation2 + $0x50] sm:$0xff]  ;;  %v7670_v36 = vld [vmem:[#allocation2 + $0x48] sm:$0xff] }
  0x1e   :  { %v449_v45 = vand.u32 4294901760, %v448_v35  ;;  %v488_v47 = vsub.f32 %v7578_v29, %v487_v37  ;;  %v469_v50 = vand.u32 4294901760, %v468_v40  ;;  %v507_v53 = vand.u32 4294901760, %v7613_v48  ;;  %v7675_v40 = vld [vmem:[#allocation2 + $0x58] sm:$0xff] }
  0x1f   :  { %6365 = vmatprep.subr.mxu0 %v530_v42  ;;  %v7621_v54 = vand.u32 4294901760, %v377_v51  ;;  %v79_v55 = vsel %vm78_vm1, %v7607_v44, 0.0  ;;  %v479_v56 = vand.u32 4294901760, %v478_v41  ;;  %v498_v57 = vsub.f32 %v7586_v34, %v497_v43 }
  0x20   :  { %6353 = vmatprep.mubr.f32.mxu0 %v449_v45  ;;  %80 = vadd.xlane.f32.xlu0 %v79_v55  ;;  %v82_v58 = vsel %vm78_vm1, %v7615_v49, 0.0  ;;  %v489_v60 = vand.u32 4294901760, %v488_v47  ;;  %v508_v61 = vsub.f32 %v7613_v48, %v507_v53  ;;  %v85_v63 = vsel %vm78_vm1, %v7618_v52, 0.0  ;;  %v7692_v47 = vld [vmem:[#allocation2 + $0x70] sm:$0xff] }
  0x21   :  { %6354 = vmatmul.mubr.f32.vlgmr.msra.gmra.mrb[0].mxu0 %v459_v46  ;;  %v7636_v62 = vsub.f32 %v377_v51, %v7621_v54  ;;  %83 = vadd.xlane.f32.xlu1 %v82_v58  ;;  %v88_v2 = vsel %vm78_vm1, %v7630_v59, 0.0  ;;  %v499_v4 = vand.u32 4294901760, %v498_v57  ;;  %v91_v8 = vsel %vm78_vm1, %v7641_v0, 0.0  ;;  %v7687_v46 = vld [vmem:[#allocation2 + $0x68] sm:$0xff]  ;;  %v7697_v51 = vld [vmem:[#allocation2 + $0x78] sm:$0xff]  ;;  %v7707_v58 = vld [vmem:[#allocation2 + $0x90] sm:$0xff] }
  0x22   :  { %6356 = vmatprep.mubr.f32.mxu0 %v469_v50  ;;  %6366 = vmatpush3.msra.mxu0 %v530_v42  ;;  %v509_v6 = vand.u32 4294901760, %v508_v61  ;;  %v94_v12 = vsel %vm78_vm1, %v7646_v5, 0.0  ;;  %v97_v18 = vsel %vm78_vm1, %v7653_v11, 0.0  ;;  %v100_v30 = vsel %vm78_vm1, %v7657_v17, 0.0  ;;  %v7682_v42 = vld [vmem:[#allocation2 + $0x60] sm:$0xff]  ;;  %v7712_v61 = vld [vmem:[#allocation2 + $0x88] sm:$0xff] }
  0x23   :  { %6379 = vmatprep.subr.mxu0 %v7548_v16  ;;  %v517_v1 = vand.u32 4294901760, %v7636_v62  ;;  %v103_v35 = vsel %vm78_vm1, %v7661_v22, 0.0  ;;  %v109_v39 = vsel %vm78_vm1, %v7665_v33, 0.0  ;;  %v106_v41 = vsel %vm78_vm1, %v7670_v36, 0.0 }
  0x24   :  { %86 = vadd.xlane.f32.xlu0 %v85_v63  ;;  %v112_v45 = vsel %vm78_vm1, %v7675_v40, 0.0  ;;  %v118_v50 = vsel %vm78_vm1, %v7687_v46, 0.0  ;;  %v121_v55 = vsel %vm78_vm1, %v7692_v47, 0.0  ;;  %v124_v57 = vsel %vm78_vm1, %v7697_v51, 0.0 }
  0x25   :  { %6357 = vmatmul.mubr.f32.gmra.mrb[2].mxu0 %v479_v56  ;;  %v518_v7 = vsub.f32 %v7636_v62, %v517_v1  ;;  %89 = vadd.xlane.f32.xlu1 %v88_v2  ;;  %v7702_v56 = vld [vmem:[#allocation2 + $0x80] sm:$0xff]  ;;  %v133_v63 = vsel %vm78_vm1, %v7707_v58, 0.0  ;;  %v7717_v2 = vld [vmem:[#allocation2 + $0x98] sm:$0xff] }
  0x26   :  { %6359 = vmatprep.mubr.f32.mxu0 %v489_v60  ;;  %v127_v60 = vsel %vm78_vm1, %v7702_v56, 0.0 }
  0x27   :  { %v519_v13 = vand.u32 4294901760, %v518_v7  ;;  %v136_v7 = vsel %vm78_vm1, %v7717_v2, 0.0 }
  0x28   :  { %92 = vadd.xlane.f32.xlu0 %v91_v8  ;;  %v7729_v8 = vld [vmem:[#allocation2 + $0xa8] sm:$0xff] }
  0x29   :  { %6360 = vmatmul.mubr.f32.gmra.mrb[4].mxu0 %v499_v4  ;;  %95 = vadd.xlane.f32.xlu1 %v94_v12  ;;  %v130_v4 = vsel %vm78_vm1, %v7712_v61, 0.0 }
  0x2a   :  { %6362 = vmatprep.mubr.f32.mxu0 %v509_v6  ;;  %v7724_v6 = vld [vmem:[#allocation2 + $0xa0] sm:$0xff] }
  0x2b   :  { %v139_v12 = vsel %vm78_vm1, %v7724_v6, 0.0 }
  0x2c   :  { %98 = vadd.xlane.f32.xlu0 %v97_v18  ;;  %v142_v18 = vsel %vm78_vm1, %v7729_v8, 0.0 }
  0x2d   :  { %6363 = vmatmul.mubr.f32.gmra.mrb[6].mxu0 %v519_v13  ;;  %101 = vadd.xlane.f32.xlu1 %v100_v30  ;;  %v7734_v13 = vld [vmem:[#allocation2 + $0xb0] sm:$0xff]  ;;  %v7739_v30 = vld [vmem:[#allocation2 + $0xb8] sm:$0xff] }
  0x2e   :  { %6367 = vmatprep.mubr.f32.mxu0 %v7533_v9 }
  0x30   :  { %104 = vadd.xlane.f32.xlu0 %v103_v35  ;;  %v145_v35 = vsel %vm78_vm1, %v7734_v13, 0.0 }
  0x31   :  { %6368 = vmatmul.mubr.f32.vlgmr.msra.gmra.mrb[0].mxu0 %v7535_v10  ;;  %110 = vadd.xlane.f32.xlu1 %v109_v39  ;;  %v7744_v39 = vld [vmem:[#allocation2 + $0xc0] sm:$0xff] }
  0x32   :  { %6370 = vmatprep.mubr.f32.mxu0 %v7543_v14  ;;  %6380 = vmatpush3.msra.mxu0 %v7548_v16  ;;  %v115_v16 = vsel %vm78_vm1, %v7682_v42, 0.0 }
  0x33   :  { %6393 = vmatprep.subr.mxu0 %v7520_v3 }
  0x34   :  { %107 = vadd.xlane.f32.xlu0 %v106_v41  ;;  %v148_v41 = vsel %vm78_vm1, %v7739_v30, 0.0 }
  0x35   :  { %6371 = vmatmul.mubr.f32.gmra.mrb[2].mxu0 %v7545_v15  ;;  %113 = vadd.xlane.f32.xlu1 %v112_v45  ;;  %v7749_v45 = vld [vmem:[#allocation2 + $0xd0] sm:$0xff] }
  0x36   :  { %6373 = vmatprep.mubr.f32.mxu0 %v7561_v21 }
  0x38   :  { %116 = vadd.xlane.f32.xlu0 %v115_v16  ;;  %v327_v16 = vlaneseq }
  0x39   :  { %6374 = vmatmul.mubr.f32.gmra.mrb[4].mxu0 %v7573_v26  ;;  %119 = vadd.xlane.f32.xlu1 %v118_v50  ;;  %v151_v50 = vsel %vm78_vm1, %v7744_v39, 0.0 }
  0x3a   :  { %6376 = vmatprep.mubr.f32.mxu0 %v7595_v38 }
  0x3c   :  { %122 = vadd.xlane.f32.xlu0 %v121_v55  ;;  %v7755_v55 = vld [vmem:[#allocation2 + $0xc8] sm:$0xff] }
  0x3d   :  { %6377 = vmatmul.mubr.f32.gmra.mrb[6].mxu0 %v7621_v54  ;;  %125 = vadd.xlane.f32.xlu1 %v124_v57  ;;  %v7757_v57 = vshrl.u32 %v327_v16, 7 }
  0x3e   :  { %6381 = vmatprep.mubr.f32.mxu0 %v7556_v19 }
  0x3f   :  { %v329_v19 = vadd.s32 8, %v7757_v57 }
  0x40   :  { %128 = vadd.xlane.f32.xlu0 %v127_v60  ;;  %v7759_v60 = vand.u32 127, %v327_v16 }
  0x41   :  { %6382 = vmatmul.mubr.f32.vlgmr.msra.gmra.mrb[0].mxu0 %v7559_v20  ;;  %134 = vadd.xlane.f32.xlu1 %v133_v63  ;;  %v157_v63 = vsel %vm78_vm1, %v7749_v45, 0.0 }
  0x42   :  { %6384 = vmatprep.mubr.f32.mxu0 %v7565_v23  ;;  %6394 = vmatpush3.msra.mxu0 %v7520_v3  ;;  %vm333_vm2 = vcmp.eq.s32.totalorder %v329_v19, %v7759_v60  ;;  %v7784_v23 = vld [vmem:[#allocation2 + $0xe8] sm:$0xff]  ;;  %vm332_vm3 = vcmp.eq.s32.totalorder %v7757_v57, %v7759_v60 }
  0x43   :  { %6407 = vmatprep.subr.mxu0 %v7571_v25 }
  0x44   :  { %131 = vadd.xlane.f32.xlu0 %v130_v4  ;;  %v7765_v4 = vld [vmem:[#allocation2 + $0xd8] sm:$0xff] }
  0x45   :  { %6385 = vmatmul.mubr.f32.gmra.mrb[2].mxu0 %v7568_v24  ;;  %137 = vadd.xlane.f32.xlu1 %v136_v7  ;;  %v7774_v7 = vld [vmem:[#allocation2 + $0xe0] sm:$0xff]  ;;  %v160_v20 = vsel %vm78_vm1, %v7765_v4, 0.0  ;;  %v7796_v24 = vld [vmem:[#allocation2 + $0xf8] sm:$0xff] }
  0x46   :  { %6387 = vmatprep.mubr.f32.mxu0 %v7578_v29 }
  0x48   :  { %140 = vadd.xlane.f32.xlu0 %v139_v12 }
  0x49   :  { %6388 = vmatmul.mubr.f32.gmra.mrb[4].mxu0 %v7586_v34  ;;  %143 = vadd.xlane.f32.xlu1 %v142_v18  ;;  %v166_v18 = vsel %vm78_vm1, %v7784_v23, 0.0 }
  0x4a   :  { %6390 = vmatprep.mubr.f32.mxu0 %v7613_v48 }
  0x4c   :  { %146 = vadd.xlane.f32.xlu0 %v145_v35 }
  0x4d   :  { %6391 = vmatmul.mubr.f32.gmra.mrb[6].mxu0 %v7636_v62  ;;  %149 = vadd.xlane.f32.xlu1 %v148_v41 }
  0x4e   :  { %6395 = vmatprep.mubr.f32.mxu0 %v447_v27  ;;  %v154_v27 = vsel %vm78_vm1, %v7755_v55, 0.0 }
  0x50   :  { %152 = vadd.xlane.f32.xlu0 %v151_v50 }
  0x51   :  { %6396 = vmatmul.mubr.f32.vlgmr.msra.gmra.mrb[0].mxu0 %v457_v28  ;;  %158 = vadd.xlane.f32.xlu1 %v157_v63  ;;  %v7459_v28 = vmov 0.0  }
  0x52   :  { %6398 = vmatprep.mubr.f32.mxu0 %v467_v31  ;;  %6408 = vmatpush3.msra.mxu0 %v7571_v25  ;;  %v7780_v12 = vsel %vm333_vm2, 1.0, %v7459_v28  ;;  %v163_v25 = vsel %vm78_vm1, %v7774_v7, 0.0  ;;  %v7790_v31 = vld [vmem:[#allocation2 + $0xf0] sm:$0xff]  ;;  %v7834_v19 = vsel %vm332_vm3, 1.0, %v7459_v28 }
  0x53   :  { %6421 = vmatprep.subr.mxu0 %v7520_v3  ;;  %v169_v29 = vsel %vm78_vm1, %v7790_v31, 0.0 }
  0x54   :  { %155 = vadd.xlane.f32.xlu0 %v154_v27 }
  0x55   :  { %6399 = vmatmul.mubr.f32.gmra.mrb[2].mxu0 %v477_v32  ;;  %161 = vadd.xlane.f32.xlu1 %v160_v20  ;;  %v172_v32 = vsel %vm78_vm1, %v7796_v24, 0.0 }
  0x56   :  { %6401 = vmatprep.mubr.f32.mxu0 %v487_v37 }
  0x58   :  { %164 = vadd.xlane.f32.xlu0 %v163_v25 }
  0x59   :  { %6402 = vmatmul.mubr.f32.gmra.mrb[4].mxu0 %v497_v43  ;;  %167 = vadd.xlane.f32.xlu1 %v166_v18 }
  0x5a   :  { %6404 = vmatprep.mubr.f32.mxu0 %v507_v53 }
  0x5c   :  { %170 = vadd.xlane.f32.xlu0 %v169_v29 }
  0x5d   :  { %6405 = vmatmul.mubr.f32.gmra.mrb[6].mxu0 %v517_v1  ;;  %173 = vadd.xlane.f32.xlu1 %v172_v32 }
  0x5e   :  { %6409 = vmatprep.mubr.f32.mxu0 %v7533_v9 }
  0x61   :  { %6410 = vmatmul.mubr.f32.vlgmr.msra.gmra.mrb[0].mxu0 %v7535_v10 }
  0x62   :  { %6412 = vmatprep.mubr.f32.mxu0 %v7543_v14  ;;  %6422 = vmatpush3.msra.mxu0 %v7520_v3 }
  0x65   :  { %6413 = vmatmul.mubr.f32.gmra.mrb[2].mxu0 %v7545_v15 }
  0x66   :  { %6415 = vmatprep.mubr.f32.mxu0 %v7561_v21 }
  0x69   :  { %6416 = vmatmul.mubr.f32.gmra.mrb[4].mxu0 %v7573_v26 }
  0x6a   :  { %6418 = vmatprep.mubr.f32.mxu0 %v7595_v38 }
  0x6d   :  { %6419 = vmatmul.mubr.f32.gmra.mrb[6].mxu0 %v7621_v54 }
  0x6e   :  { %6423 = vmatprep.mubr.f32.mxu0 %v7533_v9 }
  0x71   :  { %6424 = vmatmul.mubr.f32.vlgmr.msra.gmra.mrb[0].mxu0 %v7535_v10 }
  0x72   :  { %6426 = vmatprep.mubr.f32.mxu0 %v7543_v14 }
  0x75   :  { %6427 = vmatmul.mubr.f32.gmra.mrb[2].mxu0 %v7545_v15 }
  0x76   :  { %6429 = vmatprep.mubr.f32.mxu0 %v7561_v21 }
  0x79   :  { %6430 = vmatmul.mubr.f32.gmra.mrb[4].mxu0 %v7573_v26 }
  0x7a   :  { %6432 = vmatprep.mubr.f32.mxu0 %v7595_v38 }
  0x7d   :  { %6433 = vmatmul.mubr.f32.gmra.mrb[6].mxu0 %v7621_v54 }
  0xad   :  { %v81_v3 = vpop.xlane.xlu0 %80 }
  0xae   :  { %v175_v34 = vadd.f32 1.0, %v81_v3  ;;  %v84_v60 = vpop.xlane.xlu1 %83 }
  0xaf   :  { %v176_v29 = vadd.f32 1.0, %v84_v60 }
  0xb0   :  { %7312 = vrcp.f32 %v175_v34 }
  0xb1   :  { %v87_v37 = vpop.xlane.xlu0 %86 }
  0xb2   :  { %v177_v43 = vadd.f32 1.0, %v87_v37  ;;  %v90_v28 = vpop.xlane.xlu1 %89 }
  0xb3   :  { %v178_v3 = vadd.f32 1.0, %v90_v28 }
  0xb4   :  { %7314 = vrcp.f32 %v177_v43 }
  0xb5   :  { %v93_v9 = vpop.xlane.xlu0 %92 }
  0xb6   :  { %v179_v10 = vadd.f32 1.0, %v93_v9  ;;  %v96_v32 = vpop.xlane.xlu1 %95 }
  0xb7   :  { %v180_v34 = vadd.f32 1.0, %v96_v32 }
  0xb8   :  { %7316 = vrcp.f32 %v179_v10 }
  0xb9   :  { %v99_v14 = vpop.xlane.xlu0 %98 }
  0xba   :  { %v7313_v48 = vpop.eup %7312  ;;  %v181_v15 = vadd.f32 1.0, %v99_v14  ;;  %v102_v37 = vpop.xlane.xlu1 %101 }
  0xbb   :  { %v239_v21 = vmul.f32 %v7313_v48, %v7607_v44  ;;  %v182_v43 = vadd.f32 1.0, %v102_v37 }
  0xbc   :  { %7318 = vrcp.f32 %v181_v15 }
  0xbd   :  { %v271_v38 = vsel %vm78_vm1, %v239_v21, 0.0  ;;  %7320 = vrcp.f32 %v176_v29 }
  0xbe   :  { %v7315_v26 = vpop.eup %7314  ;;  %7322 = vrcp.f32 %v178_v3 }
  0xbf   :  { %v241_v53 = vmul.f32 %v7315_v26, %v7618_v52  ;;  %7324 = vrcp.f32 %v180_v34 }
  0xc0   :  { %7326 = vrcp.f32 %v182_v43 }
  0xc1   :  { %v272_v54 = vsel %vm78_vm1, %v241_v53, 0.0 }
  0xc2   :  { %v7317_v62 = vpop.eup %7316  ;;  %v273_v1 = vadd.f32 %v272_v54, %v271_v38  ;;  %v105_v54 = vpop.xlane.xlu0 %104 }
  0xc3   :  { %v243_v35 = vmul.f32 %v7317_v62, %v7641_v0 }
  0xc5   :  { %v274_v41 = vsel %vm78_vm1, %v243_v35, 0.0 }
  0xc6   :  { %v7319_v16 = vpop.eup %7318  ;;  %v275_v50 = vadd.f32 %v274_v41, %v273_v1 }
  0xc7   :  { %v245_v44 = vmul.f32 %v7319_v16, %v7653_v11  ;;  %v7321_v9 = vpop.eup %7320 }
  0xc8   :  { %v7323_v10 = vpop.eup %7322  ;;  %v240_v14 = vmul.f32 %v7321_v9, %v7615_v49  ;;  %v108_v49 = vpop.xlane.xlu0 %107 }
  0xc9   :  { %v276_v63 = vsel %vm78_vm1, %v245_v44, 0.0  ;;  %v242_v48 = vmul.f32 %v7323_v10, %v7630_v59  ;;  %v7325_v15 = vpop.eup %7324  ;;  %v111_v59 = vpop.xlane.xlu1 %110 }
  0xca   :  { %v277_v52 = vadd.f32 %v276_v63, %v275_v50  ;;  %v278_v21 = vsel %vm78_vm1, %v240_v14, 0.0  ;;  %v244_v38 = vmul.f32 %v7325_v15, %v7646_v5  ;;  %v7327_v53 = vpop.eup %7326  ;;  %v183_v50 = vadd.f32 1.0, %v105_v54  ;;  %v7871_v15 = vld [vmem:[%s8419_s3] ss:$0 sm:$0xff] }
  0xcb   :  { %v279_v26 = vsel %vm78_vm1, %v242_v48, 0.0  ;;  %v246_v35 = vmul.f32 %v7327_v53, %v7657_v17  ;;  %v185_v63 = vadd.f32 1.0, %v111_v59 }
  0xcc   :  { %v338_v27 = vadd.f32 %v7834_v19, %v277_v52  ;;  %v280_v62 = vadd.f32 %v279_v26, %v278_v21  ;;  %v281_v1 = vsel %vm78_vm1, %v244_v38, 0.0  ;;  %7328 = vrcp.f32 %v183_v50  ;;  %v117_v52 = vpop.xlane.xlu0 %116 }
  0xcd   :  { %v283_v16 = vsel %vm78_vm1, %v246_v35, 0.0  ;;  %7330 = vrcp.f32 %v185_v63 }
  0xce   :  { %v1127_v20 = vsel %vm78_vm1, %v338_v27, 0  ;;  %v282_v41 = vadd.f32 %v281_v1, %v280_v62  ;;  %v187_v27 = vadd.f32 1.0, %v117_v52 }
  0xcf   :  { %v7838_v0 = vand.u32 4294901760, %v1127_v20 }
  0xd0   :  { %v284_v44 = vadd.f32 %v283_v16, %v282_v41  ;;  %7332 = vrcp.f32 %v187_v27  ;;  %v123_v28 = vpop.xlane.xlu0 %122 }
  0xd1   :  { %v7841_v25 = vsub.f32 %v1127_v20, %v7838_v0  ;;  %v184_v20 = vadd.f32 1.0, %v108_v49  ;;  %v189_v32 = vadd.f32 1.0, %v123_v28 }
  0xd2   :  { %v339_v5 = vadd.f32 %v7780_v12, %v284_v44 }
  0xd3   :  { %v7844_v18 = vand.u32 4294901760, %v7841_v25  ;;  %7334 = vrcp.f32 %v184_v20 }
  0xd4   :  { %v1130_v60 = vsel %vm78_vm1, %v339_v5, 0 }
  0xd5   :  { %v1202_v11 = vsub.f32 %v7841_v25, %v7844_v18  ;;  %v7861_v29 = vand.u32 4294901760, %v1130_v60 }
  0xd6   :  { %v7329_v3 = vpop.eup %7328 }
  0xd7   :  { %v7848_v57 = vand.u32 4294901760, %v1202_v11  ;;  %v114_v11 = vpop.xlane.xlu1 %113  ;;  %v7331_v37 = vpop.eup %7330  ;;  %v7864_v43 = vsub.f32 %v1130_v60, %v7861_v29  ;;  %v247_v9 = vmul.f32 %v7329_v3, %v7661_v22 }
  0xd8   :  { %v186_v17 = vadd.f32 1.0, %v114_v11  ;;  %v249_v10 = vmul.f32 %v7331_v37, %v7665_v33 }
  0xd9   :  { %6439 = vmatprep.mubr.f32.mxu1 %v7848_v57  ;;  %v7874_v21 = vand.u32 4294901760, %v7864_v43  ;;  %v285_v53 = vsel %vm78_vm1, %v247_v9, 0.0 }
  0xda   :  { %7336 = vrcp.f32 %v186_v17  ;;  %v7333_v48 = vpop.eup %7332  ;;  %v286_v62 = vsel %vm78_vm1, %v249_v10, 0.0 }
  0xdb   :  { %v120_v34 = vpop.xlane.xlu1 %119  ;;  %7338 = vrcp.f32 %v189_v32  ;;  %v251_v22 = vmul.f32 %v7333_v48, %v7682_v42  ;;  %v1212_v49 = vsub.f32 %v7864_v43, %v7874_v21  ;;  %v287_v59 = vadd.f32 %v286_v62, %v285_v53 }
  0xdc   :  { %v188_v14 = vadd.f32 1.0, %v120_v34 }
  0xdd   :  { %v7335_v38 = vpop.eup %7334  ;;  %v288_v27 = vsel %vm78_vm1, %v251_v22, 0.0  ;;  %v7890_v3 = vand.u32 4294901760, %v1212_v49 }
  0xde   :  { %7340 = vrcp.f32 %v188_v14  ;;  %v248_v44 = vmul.f32 %v7335_v38, %v7670_v36  ;;  %v7893_v9 = vadd.f32 %v288_v27, %v287_v59 }
  0xdf   :  { %v126_v26 = vpop.xlane.xlu1 %125  ;;  %8428 = vst [vmem:[#allocation8_spill] sm:$0xff] %v7890_v3 }
  0xe0   :  { %v190_v35 = vadd.f32 1.0, %v126_v26  ;;  %v292_v34 = vsel %vm78_vm1, %v248_v44, 0.0 }
  0xe2   :  { %7342 = vrcp.f32 %v190_v35 }
  0xe4   :  { %v7337_v41 = vpop.eup %7336 }
  0xe5   :  { %v7339_v42 = vpop.eup %7338  ;;  %v250_v60 = vmul.f32 %v7337_v41, %v7675_v40 }
  0xe6   :  { %v253_v40 = vmul.f32 %v7339_v42, %v7692_v47 }
  0xe7   :  { %v293_v53 = vsel %vm78_vm1, %v250_v60, 0.0 }
 0x144   :  { %v6425_v54 = vpop.f32.mrb[0].mxu0 }
 0x145   :  { %v7131_v33 = vadd.f32 %v6425_v54, %v7871_v15  ;;  %v1080_v1 = vpop.f32.mrb[1].mxu0 }
 0x146   :  { %v7132_v16 = vadd.f32 %v7871_v15, %v1080_v1 }
 0x147   :  { %v1136_v50 = vand.u32 4294901760, %v7131_v33 }
 0x148   :  { %v1133_v63 = vand.u32 4294901760, %v7132_v16  ;;  %v6428_v52 = vpop.f32.mrb[2].mxu0 }
 0x149   :  { %v1228_v5 = vsub.f32 %v7131_v33, %v1136_v50  ;;  %v7133_v20 = vadd.f32 %v6428_v52, %v7871_v15  ;;  %v1092_v11 = vpop.f32.mrb[3].mxu0  ;;  %v7341_v33 = vpop.eup %7340 }
 0x14a   :  { %v7887_v17 = vpack.c.bf16 %v1136_v50, %v1133_v63  ;;  %v1221_v28 = vsub.f32 %v7132_v16, %v1133_v63  ;;  %v7134_v32 = vadd.f32 %v7871_v15, %v1092_v11 }
 0x14b   :  { %v1229_v36 = vand.u32 4294901760, %v1228_v5  ;;  %v1644_v37 = vand.u32 4294901760, %v7133_v20 }
 0x14c   :  { %v1222_v10 = vand.u32 4294901760, %v1221_v28  ;;  %v1641_v14 = vand.u32 4294901760, %v7134_v32  ;;  %v6431_v48 = vpop.f32.mrb[4].mxu0  ;;  %6892 = vmatprep.subr.bf16.mxu1 %v7887_v17  ;;  %v6899_v26 = vpack.c.bf16 %v1228_v5, %v1221_v28 }
 0x14d   :  { %v1736_v38 = vsub.f32 %v7133_v20, %v1644_v37  ;;  %v7135_v54 = vadd.f32 %v6431_v48, %v7871_v15  ;;  %v1104_v62 = vpop.f32.mrb[5].mxu0  ;;  %6894 = vmatpush3.bf16.msra.mxu1 %v7887_v17  ;;  %v1230_v22 = vsub.f32 %v1228_v5, %v1229_v36  ;;  %v252_v20 = vmul.f32 %v7341_v33, %v7687_v46 }
 0x14e   :  { %v7900_v1 = vpack.c.bf16 %v1644_v37, %v1641_v14  ;;  %v1729_v35 = vsub.f32 %v7134_v32, %v1641_v14  ;;  %v7136_v41 = vadd.f32 %v7871_v15, %v1104_v62  ;;  %v1223_v16 = vsub.f32 %v1221_v28, %v1222_v10  ;;  %v7343_v14 = vpop.eup %7342 }
 0x14f   :  { %v1737_v49 = vand.u32 4294901760, %v1736_v38  ;;  %v2152_v50 = vand.u32 4294901760, %v7135_v54  ;;  %v1231_v47 = vand.u32 4294901760, %v1230_v22  ;;  %v7903_v59 = vpack.c.bf16 %v1229_v36, %v1222_v10 }
 0x150   :  { %v1730_v44 = vand.u32 4294901760, %v1729_v35  ;;  %v2149_v63 = vand.u32 4294901760, %v7136_v41  ;;  %v6434_v52 = vpop.f32.mrb[6].mxu0  ;;  %6440 = vmatmul.mubr.f32.vlgmr.msra.gmra.mrb[0].mxu1 %v7890_v3  ;;  %v1224_v27 = vand.u32 4294901760, %v1223_v16  ;;  %v7906_v42 = vpack.c.bf16 %v1736_v38, %v1729_v35 }
 0x151   :  { %v2244_v5 = vsub.f32 %v7135_v54, %v2152_v50  ;;  %v7137_v11 = vadd.f32 %v6434_v52, %v7871_v15  ;;  %v1116_v60 = vpop.f32.mrb[7].mxu0  ;;  %6446 = vmatprep.mubr.f32.mxu1 %v7838_v0  ;;  %v1738_v28 = vsub.f32 %v1736_v38, %v1737_v49  ;;  %v294_v52 = vadd.f32 %v293_v53, %v292_v34 }
 0x152   :  { %v7911_v32 = vpack.c.bf16 %v2152_v50, %v2149_v63  ;;  %v2237_v36 = vsub.f32 %v7136_v41, %v2149_v63  ;;  %v7138_v37 = vadd.f32 %v7871_v15, %v1116_v60  ;;  %v6895_v10 = vpack.c.bf16 %v1231_v47, %v1224_v27 }
 0x153   :  { %v2245_v48 = vand.u32 4294901760, %v2244_v5  ;;  %v2660_v62 = vand.u32 4294901760, %v7137_v11  ;;  %v1731_v22 = vsub.f32 %v1729_v35, %v1730_v44  ;;  %v1739_v16 = vand.u32 4294901760, %v1738_v28 }
 0x154   :  { %v2238_v54 = vand.u32 4294901760, %v2237_v36  ;;  %v2657_v3 = vand.u32 4294901760, %v7138_v37  ;;  %6896 = vmatprep.subr.bf16.mxu1 %v6895_v10  ;;  %v7914_v46 = vpack.c.bf16 %v1737_v49, %v1730_v44  ;;  %v7916_v33 = vpack.c.bf16 %v2244_v5, %v2237_v36 }
 0x155   :  { %v2752_v38 = vsub.f32 %v7137_v11, %v2660_v62  ;;  %6898 = vmatpush3.bf16.msra.mxu1 %v6895_v10  ;;  %v1732_v50 = vand.u32 4294901760, %v1731_v22  ;;  %v2246_v41 = vsub.f32 %v2244_v5, %v2245_v48  ;;  %v295_v35 = vsel %vm78_vm1, %v252_v20, 0.0 }
 0x156   :  { %v7918_v63 = vpack.c.bf16 %v2660_v62, %v2657_v3  ;;  %v2745_v15 = vsub.f32 %v7138_v37, %v2657_v3  ;;  %6900 = vmatprep.subr.bf16.mxu1 %v6899_v26  ;;  %v2239_v47 = vsub.f32 %v2237_v36, %v2238_v54  ;;  %v7920_v27 = vpack.c.bf16 %v2245_v48, %v2238_v54 }
 0x157   :  { %v2753_v60 = vand.u32 4294901760, %v2752_v38  ;;  %v7923_v28 = vpack.c.bf16 %v1739_v16, %v1732_v50  ;;  %v2247_v49 = vand.u32 4294901760, %v2246_v41  ;;  %v254_v34 = vmul.f32 %v7343_v14, %v7697_v51  ;;  %v129_v51 = vpop.xlane.xlu0 %128 }
 0x158   :  { %v2746_v44 = vand.u32 4294901760, %v2745_v15  ;;  %6447 = vmatmul.mubr.f32.vlgmr.msra.gmra.mrb[0].mxu1 %v7861_v29  ;;  %v2240_v53 = vand.u32 4294901760, %v2239_v47  ;;  %v7927_v5 = vpack.c.bf16 %v2752_v38, %v2745_v15  ;;  %v290_v3 = vsel %vm78_vm1, %v253_v40, 0.0  ;;  %v135_v40 = vpop.xlane.xlu1 %134 }
 0x159   :  { %6902 = vmatpush3.bf16.msra.mxu1 %v6899_v26  ;;  %6453 = vmatprep.mubr.f32.mxu1 %v7841_v25  ;;  %v2754_v11 = vsub.f32 %v2752_v38, %v2753_v60  ;;  %v296_v10 = vadd.f32 %v295_v35, %v294_v52  ;;  %v291_v48 = vadd.f32 %v290_v3, %v7893_v9  ;;  %v297_v62 = vsel %vm78_vm1, %v254_v34, 0.0 }
 0x15a   :  { %6904 = vmatprep.subr.bf16.mxu1 %v7887_v17  ;;  %v7932_v20 = vpack.c.bf16 %v2247_v49, %v2240_v53  ;;  %v2747_v36 = vsub.f32 %v2745_v15, %v2746_v44  ;;  %v7934_v37 = vpack.c.bf16 %v2753_v60, %v2746_v44  ;;  %v191_v41 = vadd.f32 1.0, %v129_v51 }
 0x15b   :  { %v2755_v14 = vand.u32 4294901760, %v2754_v11  ;;  %v298_v16 = vadd.f32 %v297_v62, %v296_v10  ;;  %v340_v54 = vadd.f32 %v7834_v19, %v291_v48  ;;  %v132_v52 = vpop.xlane.xlu0 %131  ;;  %v193_v60 = vadd.f32 1.0, %v135_v40 }
 0x15c   :  { %v2748_v22 = vand.u32 4294901760, %v2747_v36  ;;  %v138_v38 = vpop.xlane.xlu1 %137  ;;  %v192_v49 = vadd.f32 1.0, %v132_v52  ;;  %7344 = vrcp.f32 %v191_v41 }
 0x15d   :  { %v341_v9 = vadd.f32 %v7780_v12, %v298_v16  ;;  %v1635_v50 = vsel %vm78_vm1, %v340_v54, 0  ;;  %v194_v53 = vadd.f32 1.0, %v138_v38  ;;  %7346 = vrcp.f32 %v193_v60 }
 0x15e   :  { %v7938_v26 = vpack.c.bf16 %v2755_v14, %v2748_v22  ;;  %v7947_v47 = vand.u32 4294901760, %v1635_v50  ;;  %7348 = vrcp.f32 %v192_v49 }
 0x15f   :  { %v141_v15 = vpop.xlane.xlu0 %140  ;;  %v1638_v35 = vsel %vm78_vm1, %v341_v9, 0  ;;  %7350 = vrcp.f32 %v194_v53 }
 0x160   :  { %6454 = vmatmul.mubr.f32.vlgmr.msra.gmra.mrb[0].mxu1 %v7864_v43  ;;  %v144_v44 = vpop.xlane.xlu1 %143  ;;  %v7954_v34 = vand.u32 4294901760, %v1638_v35  ;;  %v7957_v3 = vsub.f32 %v1635_v50, %v7947_v47  ;;  %v195_v11 = vadd.f32 1.0, %v141_v15 }
 0x161   :  { %6906 = vmatpush3.bf16.msra.mxu1 %v7887_v17  ;;  %6460 = vmatprep.mubr.f32.mxu1 %v7844_v18  ;;  %v196_v51 = vadd.f32 1.0, %v144_v44 }
 0x162   :  { %6908 = vmatprep.subr.bf16.mxu1 %v7903_v59  ;;  %v7960_v10 = vsub.f32 %v1638_v35, %v7954_v34  ;;  %7352 = vrcp.f32 %v195_v11 }
 0x163   :  { %v147_v36 = vpop.xlane.xlu0 %146  ;;  %7354 = vrcp.f32 %v196_v51 }
 0x164   :  { %v197_v14 = vadd.f32 1.0, %v147_v36  ;;  %v150_v48 = vpop.xlane.xlu1 %149  ;;  %v7970_v62 = vand.u32 4294901760, %v7960_v10 }
 0x165   :  { %v198_v40 = vadd.f32 1.0, %v150_v48 }
 0x166   :  { %7356 = vrcp.f32 %v197_v14  ;;  %v7345_v16 = vpop.eup %7344  ;;  %v1720_v52 = vsub.f32 %v7960_v10, %v7970_v62 }
 0x167   :  { %v7347_v54 = vpop.eup %7346  ;;  %7358 = vrcp.f32 %v198_v40  ;;  %v255_v50 = vmul.f32 %v7345_v16, %v7702_v56 }
 0x168   :  { %6461 = vmatmul.mubr.f32.vlgmr.msra.gmra.mrb[0].mxu1 %v7874_v21  ;;  %v257_v41 = vmul.f32 %v7347_v54, %v7707_v58  ;;  %v7984_v35 = vand.u32 4294901760, %v1720_v52  ;;  %v153_v52 = vpop.xlane.xlu0 %152 }
 0x169   :  { %6910 = vmatpush3.bf16.msra.mxu1 %v7903_v59  ;;  %6467 = vmatprep.mubr.f32.mxu1 %v7838_v0  ;;  %v7963_v59 = vand.u32 4294901760, %v7957_v3  ;;  %v299_v56 = vsel %vm78_vm1, %v255_v50, 0.0 }
 0x16a   :  { %6912 = vmatprep.subr.bf16.mxu1 %v7887_v17  ;;  %v300_v58 = vsel %vm78_vm1, %v257_v41, 0.0 }
 0x16b   :  { %v1710_v22 = vsub.f32 %v7957_v3, %v7963_v59  ;;  %v301_v36 = vadd.f32 %v300_v58, %v299_v56 }
 0x16d   :  { %v7976_v9 = vand.u32 4294901760, %v1710_v22 }
 0x170   :  { %6468 = vmatmul.mubr.f32.vlgmr.msra.gmra.mrb[0].mxu1 %v7861_v29 }
 0x171   :  { %6914 = vmatpush3.bf16.msra.mxu1 %v7887_v17  ;;  %6474 = vmatprep.mubr.f32.mxu1 %v7838_v0  ;;  %v7349_v17 = vpop.eup %7348 }
 0x172   :  { %6916 = vmatprep.subr.bf16.mxu1 %v7900_v1  ;;  %v7351_v38 = vpop.eup %7350  ;;  %v256_v60 = vmul.f32 %v7349_v17, %v7712_v61 }
 0x173   :  { %v7353_v15 = vpop.eup %7352  ;;  %v258_v49 = vmul.f32 %v7351_v38, %v7717_v2  ;;  %v159_v38 = vpop.xlane.xlu1 %158 }
 0x174   :  { %v7355_v44 = vpop.eup %7354  ;;  %v259_v53 = vmul.f32 %v7353_v15, %v7724_v6  ;;  %v306_v61 = vsel %vm78_vm1, %v256_v60, 0.0 }
 0x175   :  { %v7357_v11 = vpop.eup %7356  ;;  %v307_v2 = vsel %vm78_vm1, %v258_v49, 0.0  ;;  %v260_v51 = vmul.f32 %v7355_v44, %v7729_v8  ;;  %v199_v49 = vadd.f32 1.0, %v153_v52 }
 0x176   :  { %v7359_v14 = vpop.eup %7358  ;;  %v302_v48 = vsel %vm78_vm1, %v259_v53, 0.0  ;;  %v261_v22 = vmul.f32 %v7357_v11, %v7734_v13  ;;  %v308_v6 = vadd.f32 %v307_v2, %v306_v61  ;;  %v201_v53 = vadd.f32 1.0, %v159_v38 }
 0x177   :  { %v303_v40 = vadd.f32 %v302_v48, %v301_v36  ;;  %v262_v16 = vmul.f32 %v7359_v14, %v7739_v30  ;;  %v162_v15 = vpop.xlane.xlu1 %161  ;;  %7360 = vrcp.f32 %v199_v49 }
 0x178   :  { %6475 = vmatmul.mubr.f32.vlgmr.msra.gmra.mrb[0].mxu1 %v7861_v29  ;;  %v304_v54 = vsel %vm78_vm1, %v261_v22, 0.0  ;;  %v202_v2 = vadd.f32 1.0, %v162_v15  ;;  %7362 = vrcp.f32 %v201_v53 }
 0x179   :  { %6918 = vmatpush3.bf16.msra.mxu1 %v7900_v1  ;;  %6481 = vmatprep.mubr.f32.mxu1 %v7976_v9  ;;  %v305_v17 = vadd.f32 %v304_v54, %v303_v40  ;;  %v311_v13 = vsel %vm78_vm1, %v262_v16, 0.0 }
 0x17a   :  { %6920 = vmatprep.subr.bf16.mxu1 %v7923_v28 }
 0x17b   :  { %v342_v30 = vadd.f32 %v7834_v19, %v305_v17  ;;  %v168_v36 = vpop.xlane.xlu1 %167 }
 0x17c   :  { %6482 = vmatmul.mubr.f32.vlgmr.msra.gmra.mrb[2].mxu1 %v7984_v35 }
 0x17d   :  { %6922 = vmatpush3.bf16.msra.mxu1 %v7923_v28  ;;  %6488 = vmatprep.mubr.f32.mxu1 %v7947_v47  ;;  %v309_v28 = vsel %vm78_vm1, %v260_v51, 0.0  ;;  %v2143_v60 = vsel %vm78_vm1, %v342_v30, 0 }
 0x17e   :  { %6924 = vmatprep.subr.bf16.mxu1 %v7906_v42  ;;  %v310_v8 = vadd.f32 %v309_v28, %v308_v6  ;;  %v8015_v56 = vand.u32 4294901760, %v2143_v60  ;;  %v204_v6 = vadd.f32 1.0, %v168_v36 }
 0x17f   :  { %v174_v28 = vpop.xlane.xlu1 %173 }
 0x180   :  { %v312_v50 = vadd.f32 %v311_v13, %v310_v8  ;;  %v8025_v51 = vsub.f32 %v2143_v60, %v8015_v56  ;;  %v206_v8 = vadd.f32 1.0, %v174_v28 }
 0x181   :  { %v7361_v52 = vpop.eup %7360 }
 0x182   :  { %v343_v41 = vadd.f32 %v7780_v12, %v312_v50  ;;  %v7363_v17 = vpop.eup %7362  ;;  %v263_v30 = vmul.f32 %v7361_v52, %v7744_v39 }
 0x184   :  { %6489 = vmatmul.mubr.f32.vlgmr.msra.gmra.mrb[2].mxu1 %v7954_v34  ;;  %v2146_v58 = vsel %vm78_vm1, %v343_v41, 0  ;;  %v313_v39 = vsel %vm78_vm1, %v263_v30, 0.0 }
 0x185   :  { %6926 = vmatpush3.bf16.msra.mxu1 %v7906_v42  ;;  %6495 = vmatprep.mubr.f32.mxu1 %v7957_v3  ;;  %v156_v42 = vpop.xlane.xlu0 %155  ;;  %v8022_v61 = vand.u32 4294901760, %v2146_v58 }
 0x186   :  { %6928 = vmatprep.subr.bf16.mxu1 %v7900_v1  ;;  %v200_v11 = vadd.f32 1.0, %v156_v42  ;;  %v265_v42 = vmul.f32 %v7363_v17, %v7749_v45 }
 0x187   :  { %v8028_v22 = vsub.f32 %v2146_v58, %v8022_v61 }
 0x188   :  { %7364 = vrcp.f32 %v200_v11  ;;  %v314_v45 = vsel %vm78_vm1, %v265_v42, 0.0 }
 0x189   :  { %v165_v44 = vpop.xlane.xlu0 %164  ;;  %7366 = vrcp.f32 %v202_v2  ;;  %v8038_v16 = vand.u32 4294901760, %v8028_v22  ;;  %v315_v11 = vadd.f32 %v314_v45, %v313_v39  ;;  %v3168_v45 = vld [vmem:[%s8420_s4 + $0x10] sm:$0xff] }
 0x18a   :  { %v203_v14 = vadd.f32 1.0, %v165_v44 }
 0x18b   :  { %v2228_v13 = vsub.f32 %v8028_v22, %v8038_v16 }
 0x18c   :  { %6496 = vmatmul.mubr.f32.vlgmr.msra.gmra.mrb[2].mxu1 %v7960_v10  ;;  %7368 = vrcp.f32 %v203_v14 }
 0x18d   :  { %6930 = vmatpush3.bf16.msra.mxu1 %v7900_v1  ;;  %6502 = vmatprep.mubr.f32.mxu1 %v7963_v59  ;;  %v171_v48 = vpop.xlane.xlu0 %170  ;;  %7370 = vrcp.f32 %v204_v6  ;;  %v8052_v15 = vand.u32 4294901760, %v2228_v13 }
 0x18e   :  { %6932 = vmatprep.subr.bf16.mxu1 %v7914_v46  ;;  %v205_v40 = vadd.f32 1.0, %v171_v48 }
 0x190   :  { %7372 = vrcp.f32 %v205_v40 }
 0x191   :  { %7374 = vrcp.f32 %v206_v8 }
 0x194   :  { %6503 = vmatmul.mubr.f32.vlgmr.msra.gmra.mrb[2].mxu1 %v7970_v62 }
 0x195   :  { %6934 = vmatpush3.bf16.msra.mxu1 %v7914_v46  ;;  %6509 = vmatprep.mubr.f32.mxu1 %v7947_v47  ;;  %v8031_v46 = vand.u32 4294901760, %v8025_v51 }
 0x196   :  { %6936 = vmatprep.subr.bf16.mxu1 %v7900_v1 }
 0x197   :  { %v2218_v54 = vsub.f32 %v8025_v51, %v8031_v46 }
 0x199   :  { %v8044_v38 = vand.u32 4294901760, %v2218_v54 }
 0x19c   :  { %6510 = vmatmul.mubr.f32.vlgmr.msra.gmra.mrb[2].mxu1 %v7954_v34 }
 0x19d   :  { %6938 = vmatpush3.bf16.msra.mxu1 %v7900_v1  ;;  %6516 = vmatprep.mubr.f32.mxu1 %v7947_v47  ;;  %v7365_v1 = vpop.eup %7364 }
 0x19e   :  { %6940 = vmatprep.subr.bf16.mxu1 %v7911_v32  ;;  %v7367_v50 = vpop.eup %7366  ;;  %v264_v60 = vmul.f32 %v7365_v1, %v7755_v55 }
 0x19f   :  { %v7369_v41 = vpop.eup %7368  ;;  %v266_v49 = vmul.f32 %v7367_v50, %v7765_v4 }
 0x1a0   :  { %v7371_v44 = vpop.eup %7370  ;;  %v267_v58 = vmul.f32 %v7369_v41, %v7774_v7  ;;  %v320_v55 = vsel %vm78_vm1, %v264_v60, 0.0  ;;  %v3166_v60 = vld [vmem:[%s8420_s4] sm:$0xff] }
 0x1a1   :  { %v7373_v53 = vpop.eup %7372  ;;  %v321_v4 = vsel %vm78_vm1, %v266_v49, 0.0  ;;  %v268_v36 = vmul.f32 %v7371_v44, %v7784_v23  ;;  %v3167_v49 = vld [vmem:[%s8420_s4 + $0x8] sm:$0xff]  ;;  %v3203_v44 = vand.u32 4294901760, %v3166_v60 }
 0x1a2   :  { %v7375_v2 = vpop.eup %7374  ;;  %v316_v14 = vsel %vm78_vm1, %v267_v58, 0.0  ;;  %v269_v48 = vmul.f32 %v7373_v53, %v7790_v31  ;;  %v322_v7 = vadd.f32 %v321_v4, %v320_v55  ;;  %v3206_v39 = vand.u32 4294901760, %v3167_v49 }
 0x1a3   :  { %v317_v6 = vadd.f32 %v316_v14, %v315_v11  ;;  %v270_v40 = vmul.f32 %v7375_v2, %v7796_v24  ;;  %v3209_v58 = vand.u32 4294901760, %v3168_v45 }
 0x1a4   :  { %6517 = vmatmul.mubr.f32.vlgmr.msra.gmra.mrb[2].mxu1 %v7954_v34  ;;  %v318_v28 = vsel %vm78_vm1, %v269_v48, 0.0  ;;  %v8137_v11 = vpack.c.bf16 %v3206_v39, %v3203_v44 }
 0x1a5   :  { %6942 = vmatpush3.bf16.msra.mxu1 %v7911_v32  ;;  %6523 = vmatprep.mubr.f32.mxu1 %v8044_v38  ;;  %v319_v54 = vadd.f32 %v318_v28, %v317_v6  ;;  %v325_v31 = vsel %vm78_vm1, %v270_v40, 0.0 }
 0x1a6   :  { %6944 = vmatprep.subr.bf16.mxu1 %v7932_v20  ;;  %6988 = vmatprep.subr.bf16.mxu0 %v8137_v11 }
 0x1a7   :  { %v344_v52 = vadd.f32 %v7834_v19, %v319_v54  ;;  %6990 = vmatpush3.bf16.msra.mxu0 %v8137_v11 }
 0x1a8   :  { %6524 = vmatmul.mubr.f32.vlgmr.msra.gmra.mrb[4].mxu1 %v8052_v15 }
 0x1a9   :  { %6946 = vmatpush3.bf16.msra.mxu1 %v7932_v20  ;;  %6530 = vmatprep.mubr.f32.mxu1 %v8015_v56  ;;  %v323_v20 = vsel %vm78_vm1, %v268_v36, 0.0  ;;  %v8161_v36 = vsub.f32 %v3166_v60, %v3203_v44 }
 0x1aa   :  { %6948 = vmatprep.subr.bf16.mxu1 %v7916_v33  ;;  %v324_v23 = vadd.f32 %v323_v20, %v322_v7 }
 0x1ab   :  { %v3354_v2 = vand.u32 4294901760, %v8161_v36 }
 0x1ac   :  { %v326_v8 = vadd.f32 %v325_v31, %v324_v23 }
 0x1ad   :  { %v3355_v48 = vsub.f32 %v8161_v36, %v3354_v2 }
 0x1ae   :  { %v345_v24 = vadd.f32 %v7780_v12, %v326_v8 }
 0x1af   :  { %v3356_v40 = vand.u32 4294901760, %v3355_v48 }
 0x1b0   :  { %6531 = vmatmul.mubr.f32.vlgmr.msra.gmra.mrb[4].mxu1 %v8022_v61  ;;  %v2654_v13 = vsel %vm78_vm1, %v345_v24, 0 }
 0x1b1   :  { %6950 = vmatpush3.bf16.msra.mxu1 %v7916_v33  ;;  %6537 = vmatprep.mubr.f32.mxu1 %v8025_v51  ;;  %v2651_v33 = vsel %vm78_vm1, %v344_v52, 0  ;;  %v8090_v19 = vand.u32 4294901760, %v2654_v13 }
 0x1b2   :  { %6952 = vmatprep.subr.bf16.mxu1 %v7911_v32  ;;  %v8083_v17 = vand.u32 4294901760, %v2651_v33 }
 0x1b3   :  { %v8096_v12 = vsub.f32 %v2654_v13, %v8090_v19 }
 0x1b4   :  { %v8093_v1 = vsub.f32 %v2651_v33, %v8083_v17 }
 0x1b6   :  { %v8099_v50 = vand.u32 4294901760, %v8093_v1 }
 0x1b8   :  { %6538 = vmatmul.mubr.f32.vlgmr.msra.gmra.mrb[4].mxu1 %v8028_v22  ;;  %v2726_v30 = vsub.f32 %v8093_v1, %v8099_v50 }
 0x1b9   :  { %6954 = vmatpush3.bf16.msra.mxu1 %v7911_v32  ;;  %6544 = vmatprep.mubr.f32.mxu1 %v8031_v46 }
 0x1ba   :  { %6956 = vmatprep.subr.bf16.mxu1 %v7920_v27  ;;  %v8112_v41 = vand.u32 4294901760, %v2726_v30 }
 0x1c0   :  { %6545 = vmatmul.mubr.f32.vlgmr.msra.gmra.mrb[4].mxu1 %v8038_v16 }
 0x1c1   :  { %6958 = vmatpush3.bf16.msra.mxu1 %v7920_v27  ;;  %6551 = vmatprep.mubr.f32.mxu1 %v8015_v56  ;;  %v8106_v27 = vand.u32 4294901760, %v8096_v12 }
 0x1c2   :  { %6960 = vmatprep.subr.bf16.mxu1 %v7911_v32 }
 0x1c3   :  { %v2736_v42 = vsub.f32 %v8096_v12, %v8106_v27 }
 0x1c8   :  { %6552 = vmatmul.mubr.f32.vlgmr.msra.gmra.mrb[4].mxu1 %v8022_v61 }
 0x1c9   :  { %6962 = vmatpush3.bf16.msra.mxu1 %v7911_v32  ;;  %6558 = vmatprep.mubr.f32.mxu1 %v8015_v56  ;;  %v8118_v32 = vand.u32 4294901760, %v2736_v42  ;;  %v3367_v42 = vsub.f32 %v3168_v45, %v3209_v58 }
 0x1ca   :  { %6964 = vmatprep.subr.bf16.mxu1 %v7918_v63 }
 0x1d0   :  { %6559 = vmatmul.mubr.f32.vlgmr.msra.gmra.mrb[4].mxu1 %v8022_v61 }
 0x1d1   :  { %6966 = vmatpush3.bf16.msra.mxu1 %v7918_v63  ;;  %6565 = vmatprep.mubr.f32.mxu1 %v8112_v41 }
 0x1d2   :  { %6968 = vmatprep.subr.bf16.mxu1 %v7938_v26 }
 0x1d4   :  { %6566 = vmatmul.mubr.f32.vlgmr.msra.gmra.mrb[6].mxu1 %v8118_v32 }
 0x1d5   :  { %6970 = vmatpush3.bf16.msra.mxu1 %v7938_v26  ;;  %6572 = vmatprep.mubr.f32.mxu1 %v8083_v17  ;;  %v3169_v26 = vld [vmem:[%s8420_s4 + $0x18] sm:$0xff] }
 0x1d6   :  { %6972 = vmatprep.subr.bf16.mxu1 %v7927_v5  ;;  %v3212_v53 = vand.u32 4294901760, %v3169_v26 }
 0x1d8   :  { %v8141_v55 = vpack.c.bf16 %v3212_v53, %v3209_v58  ;;  %v3374_v60 = vsub.f32 %v3169_v26, %v3212_v53 }
 0x1da   :  { %6992 = vmatprep.subr.bf16.mxu0 %v8141_v55  ;;  %v8189_v58 = vpack.c.bf16 %v3374_v60, %v3367_v42 }
 0x1db   :  { %6994 = vmatpush3.bf16.msra.mxu0 %v8141_v55 }
 0x1dc   :  { %6573 = vmatmul.mubr.f32.vlgmr.msra.gmra.mrb[6].mxu1 %v8090_v19 }
 0x1dd   :  { %6974 = vmatpush3.bf16.msra.mxu1 %v7927_v5  ;;  %6579 = vmatprep.mubr.f32.mxu1 %v8093_v1 }
 0x1de   :  { %6976 = vmatprep.subr.bf16.mxu1 %v7918_v63 }
 0x1e4   :  { %6580 = vmatmul.mubr.f32.vlgmr.msra.gmra.mrb[6].mxu1 %v8096_v12 }
 0x1e5   :  { %6978 = vmatpush3.bf16.msra.mxu1 %v7918_v63  ;;  %6586 = vmatprep.mubr.f32.mxu1 %v8099_v50 }
 0x1e6   :  { %6980 = vmatprep.subr.bf16.mxu1 %v7934_v37 }
 0x1ec   :  { %6587 = vmatmul.mubr.f32.vlgmr.msra.gmra.mrb[6].mxu1 %v8106_v27 }
 0x1ed   :  { %6982 = vmatpush3.bf16.msra.mxu1 %v7934_v37  ;;  %6593 = vmatprep.mubr.f32.mxu1 %v8083_v17  ;;  %v3360_v37 = vsub.f32 %v3167_v49, %v3206_v39  ;;  %v3368_v39 = vand.u32 4294901760, %v3367_v42 }
 0x1ee   :  { %6984 = vmatprep.subr.bf16.mxu1 %v7918_v63 }
 0x1ef   :  { %v3361_v14 = vand.u32 4294901760, %v3360_v37 }
 0x1f4   :  { %6594 = vmatmul.mubr.f32.vlgmr.msra.gmra.mrb[6].mxu1 %v8090_v19 }
 0x1f5   :  { %6986 = vmatpush3.bf16.msra.mxu1 %v7918_v63  ;;  %6600 = vmatprep.mubr.f32.mxu1 %v8083_v17  ;;  %v3362_v63 = vsub.f32 %v3360_v37, %v3361_v14 }
 0x1fc   :  { %6601 = vmatmul.mubr.f32.vlgmr.msra.gmra.mrb[6].mxu1 %v8090_v19 }
 0x1fd   :  { %6727 = vmatprep.mubr.f32.mxu1 %v7848_v57  ;;  %v3363_v57 = vand.u32 4294901760, %v3362_v63 }
 0x1ff   :  { %v6995_v31 = vpack.c.bf16 %v3363_v57, %v3356_v40 }
 0x201   :  { %6996 = vmatprep.subr.bf16.mxu0 %v6995_v31 }
 0x24b   :  { %v6476_v5 = vpop.f32.mrb[0].mxu1 }
 0x24c   :  { %7376 = vtanh.f32 %v6476_v5  ;;  %v1624_v4 = vpop.f32.mrb[1].mxu1  ;;  %v3375_v5 = vand.u32 4294901760, %v3374_v60 }
 0x24d   :  { %7378 = vtanh.f32 %v1624_v4  ;;  %v3369_v4 = vsub.f32 %v3367_v42, %v3368_v39 }
 0x24e   :  { %v3376_v48 = vsub.f32 %v3374_v60, %v3375_v5 }
 0x24f   :  { %v3370_v63 = vand.u32 4294901760, %v3369_v4 }
 0x256   :  { %v7377_v7 = vpop.eup %7376 }
 0x257   :  { %v7379_v6 = vpop.eup %7378  ;;  %v3182_v20 = vsel %vm3177_vm4, %v7377_v7, 0  ;;  %v3377_v7 = vand.u32 4294901760, %v3376_v48  ;;  %v8211_v48 = vpack.c.bf16 %v3361_v14, %v3354_v2 }
 0x258   :  { %v8166_v28 = vand.u32 4294901760, %v3182_v20  ;;  %v3179_v23 = vsel %vm3177_vm4, %v7379_v6, 0 }
 0x259   :  { %v8169_v54 = vand.u32 4294901760, %v3179_v23  ;;  %v6999_v6 = vpack.c.bf16 %v3377_v7, %v3370_v63  ;;  %v8213_v63 = vpack.c.bf16 %v3375_v5, %v3368_v39 }
 0x25a   :  { %v8172_v8 = vsub.f32 %v3182_v20, %v8166_v28  ;;  %v8186_v20 = vpack.c.bf16 %v3360_v37, %v8161_v36 }
 0x25b   :  { %v8175_v52 = vsub.f32 %v3179_v23, %v8169_v54 }
 0x25c   :  { %v8426_v24 = vand.u32 4294901760, %v8172_v8 }
 0x25d   :  { %v8427_v33 = vand.u32 4294901760, %v8175_v52 }
 0x25e   :  { %v3284_v13 = vsub.f32 %v8172_v8, %v8426_v24 }
 0x25f   :  { %v3274_v30 = vsub.f32 %v8175_v52, %v8427_v33 }
 0x260   :  { %v3285_v44 = vand.u32 4294901760, %v3284_v13 }
 0x261   :  { %v3275_v49 = vand.u32 4294901760, %v3274_v30 }
 0x263   :  { %6611 = vmatprep.mubr.f32.mxu0 %v3275_v49 }
 0x264   :  { %6612 = vmatmul.mubr.f32.vlgmr.msra.gmra.mrb[8].mxu0 %v3285_v44 }
 0x265   :  { %6998 = vmatpush3.bf16.msra.mxu0 %v6995_v31 }
 0x266   :  { %7000 = vmatprep.subr.bf16.mxu0 %v6999_v6 }
 0x269   :  { %7002 = vmatpush3.bf16.msra.mxu0 %v6999_v6 }
 0x26a   :  { %7004 = vmatprep.subr.bf16.mxu0 %v8186_v20 }
 0x277   :  { %v6518_v45 = vpop.f32.mrb[2].mxu1 }
 0x278   :  { %7380 = vtanh.f32 %v6518_v45  ;;  %v2132_v26 = vpop.f32.mrb[3].mxu1 }
 0x279   :  { %7382 = vtanh.f32 %v2132_v26 }
 0x282   :  { %v7381_v53 = vpop.eup %7380 }
 0x283   :  { %v7383_v40 = vpop.eup %7382  ;;  %v3188_v57 = vsel %vm3177_vm4, %v7381_v53, 0 }
 0x284   :  { %v3185_v23 = vsel %vm3177_vm4, %v7383_v40, 0  ;;  %v8193_v31 = vand.u32 4294901760, %v3188_v57 }
 0x285   :  { %v8195_v13 = vand.u32 4294901760, %v3185_v23 }
 0x286   :  { %v8198_v36 = vsub.f32 %v3188_v57, %v8193_v31 }
 0x287   :  { %v8201_v37 = vsub.f32 %v3185_v23, %v8195_v13 }
 0x288   :  { %v8424_v30 = vand.u32 4294901760, %v8198_v36 }
 0x289   :  { %v8425_v42 = vand.u32 4294901760, %v8201_v37 }
 0x28a   :  { %v3304_v60 = vsub.f32 %v8198_v36, %v8424_v30 }
 0x28b   :  { %v3294_v49 = vsub.f32 %v8201_v37, %v8425_v42 }
 0x28c   :  { %v3305_v4 = vand.u32 4294901760, %v3304_v60 }
 0x28d   :  { %v3295_v44 = vand.u32 4294901760, %v3294_v49 }
 0x28f   :  { %6614 = vmatprep.mubr.f32.mxu0 %v3295_v44 }
 0x290   :  { %6615 = vmatmul.mubr.f32.gmra.mrb[10].mxu0 %v3305_v4 }
 0x2a3   :  { %v6560_v7 = vpop.f32.mrb[4].mxu1 }
 0x2a4   :  { %7384 = vtanh.f32 %v6560_v7  ;;  %v2640_v6 = vpop.f32.mrb[5].mxu1 }
 0x2a5   :  { %7386 = vtanh.f32 %v2640_v6 }
 0x2ae   :  { %v7385_v45 = vpop.eup %7384 }
 0x2af   :  { %v7387_v26 = vpop.eup %7386  ;;  %v3194_v53 = vsel %vm3177_vm4, %v7385_v45, 0 }
 0x2b0   :  { %v3191_v40 = vsel %vm3177_vm4, %v7387_v26, 0  ;;  %v8217_v57 = vand.u32 4294901760, %v3194_v53 }
 0x2b1   :  { %v8219_v23 = vand.u32 4294901760, %v3191_v40 }
 0x2b2   :  { %v8222_v60 = vsub.f32 %v3194_v53, %v8217_v57 }
 0x2b3   :  { %v3312_v2 = vsub.f32 %v3191_v40, %v8219_v23 }
 0x2b4   :  { %v3323_v14 = vand.u32 4294901760, %v8222_v60 }
 0x2b5   :  { %v3313_v39 = vand.u32 4294901760, %v3312_v2 }
 0x2b6   :  { %v3324_v5 = vsub.f32 %v8222_v60, %v3323_v14 }
 0x2b7   :  { %v3314_v49 = vsub.f32 %v3312_v2, %v3313_v39 }
 0x2b8   :  { %v3325_v4 = vand.u32 4294901760, %v3324_v5 }
 0x2b9   :  { %v3315_v44 = vand.u32 4294901760, %v3314_v49 }
 0x2bb   :  { %6617 = vmatprep.mubr.f32.mxu0 %v3315_v44 }
 0x2bc   :  { %6618 = vmatmul.mubr.f32.gmra.mrb[12].mxu0 %v3325_v4 }
 0x2cf   :  { %v6602_v7 = vpop.f32.mrb[6].mxu1 }
 0x2d0   :  { %7388 = vtanh.f32 %v6602_v7  ;;  %v3148_v6 = vpop.f32.mrb[7].mxu1 }
 0x2d1   :  { %7390 = vtanh.f32 %v3148_v6 }
 0x2da   :  { %v7389_v45 = vpop.eup %7388 }
 0x2db   :  { %v7391_v26 = vpop.eup %7390  ;;  %v3200_v53 = vsel %vm3177_vm4, %v7389_v45, 0 }
 0x2dc   :  { %v3197_v40 = vsel %vm3177_vm4, %v7391_v26, 0  ;;  %v8229_v30 = vand.u32 4294901760, %v3200_v53 }
 0x2dd   :  { %v8231_v42 = vand.u32 4294901760, %v3197_v40 }
 0x2de   :  { %v3342_v24 = vsub.f32 %v3200_v53, %v8229_v30 }
 0x2df   :  { %v3332_v5 = vsub.f32 %v3197_v40, %v8231_v42 }
 0x2e0   :  { %v3343_v49 = vand.u32 4294901760, %v3342_v24 }
 0x2e1   :  { %v3333_v44 = vand.u32 4294901760, %v3332_v5 }
 0x2e2   :  { %v3344_v4 = vsub.f32 %v3342_v24, %v3343_v49 }
 0x2e3   :  { %v3334_v7 = vsub.f32 %v3332_v5, %v3333_v44 }
 0x2e4   :  { %v3345_v6 = vand.u32 4294901760, %v3344_v4 }
 0x2e5   :  { %v3335_v33 = vand.u32 4294901760, %v3334_v7 }
 0x2e7   :  { %6620 = vmatprep.mubr.f32.mxu0 %v3335_v33  ;;  %v8429_v33 = vand.u32 4294901760, %v8175_v52 }
 0x2e8   :  { %6621 = vmatmul.mubr.f32.gmra.mrb[14].mxu0 %v3345_v6 }
 0x2e9   :  { %6631 = vmatprep.mubr.f32.mxu0 %v8169_v54 }
 0x2ec   :  { %6632 = vmatmul.mubr.f32.vlgmr.msra.gmra.mrb[8].mxu0 %v8166_v28 }
 0x2ed   :  { %6634 = vmatprep.mubr.f32.mxu0 %v8195_v13  ;;  %7006 = vmatpush3.bf16.msra.mxu0 %v8186_v20  ;;  %v8430_v20 = vand.u32 4294901760, %v8172_v8 }
 0x2ee   :  { %7008 = vmatprep.subr.bf16.mxu0 %v8189_v58 }
 0x2f0   :  { %6635 = vmatmul.mubr.f32.gmra.mrb[10].mxu0 %v8193_v31 }
 0x2f1   :  { %6637 = vmatprep.mubr.f32.mxu0 %v8219_v23  ;;  %7010 = vmatpush3.bf16.msra.mxu0 %v8189_v58  ;;  %v8431_v58 = vand.u32 4294901760, %v8201_v37 }
 0x2f2   :  { %7012 = vmatprep.subr.bf16.mxu0 %v8137_v11 }
 0x2f4   :  { %6638 = vmatmul.mubr.f32.gmra.mrb[12].mxu0 %v8217_v57 }
 0x2f5   :  { %6640 = vmatprep.mubr.f32.mxu0 %v8231_v42 }
 0x2f8   :  { %6641 = vmatmul.mubr.f32.gmra.mrb[14].mxu0 %v8229_v30 }
 0x2f9   :  { %6651 = vmatprep.mubr.f32.mxu0 %v8175_v52 }
 0x2fc   :  { %6652 = vmatmul.mubr.f32.vlgmr.msra.gmra.mrb[8].mxu0 %v8172_v8 }
 0x2fd   :  { %6654 = vmatprep.mubr.f32.mxu0 %v8201_v37  ;;  %7014 = vmatpush3.bf16.msra.mxu0 %v8137_v11 }
 0x2fe   :  { %7016 = vmatprep.subr.bf16.mxu0 %v8141_v55 }
 0x300   :  { %6655 = vmatmul.mubr.f32.gmra.mrb[10].mxu0 %v8198_v36 }
 0x301   :  { %6657 = vmatprep.mubr.f32.mxu0 %v3312_v2  ;;  %7018 = vmatpush3.bf16.msra.mxu0 %v8141_v55  ;;  %v8432_v2 = vand.u32 4294901760, %v8198_v36 }
 0x302   :  { %7020 = vmatprep.subr.bf16.mxu0 %v8211_v48 }
 0x304   :  { %6658 = vmatmul.mubr.f32.gmra.mrb[12].mxu0 %v8222_v60 }
 0x305   :  { %6660 = vmatprep.mubr.f32.mxu0 %v3332_v5 }
 0x308   :  { %6661 = vmatmul.mubr.f32.gmra.mrb[14].mxu0 %v3342_v24 }
 0x309   :  { %6671 = vmatprep.mubr.f32.mxu0 %v8429_v33 }
 0x30c   :  { %6672 = vmatmul.mubr.f32.vlgmr.msra.gmra.mrb[8].mxu0 %v8430_v20 }
 0x30d   :  { %6674 = vmatprep.mubr.f32.mxu0 %v8431_v58  ;;  %7022 = vmatpush3.bf16.msra.mxu0 %v8211_v48 }
 0x30e   :  { %7024 = vmatprep.subr.bf16.mxu0 %v8213_v63 }
 0x310   :  { %6675 = vmatmul.mubr.f32.gmra.mrb[10].mxu0 %v8432_v2 }
 0x311   :  { %6677 = vmatprep.mubr.f32.mxu0 %v3313_v39  ;;  %7026 = vmatpush3.bf16.msra.mxu0 %v8213_v63 }
 0x312   :  { %7028 = vmatprep.subr.bf16.mxu0 %v8137_v11 }
 0x314   :  { %6678 = vmatmul.mubr.f32.gmra.mrb[12].mxu0 %v3323_v14 }
 0x315   :  { %6680 = vmatprep.mubr.f32.mxu0 %v3333_v44 }
 0x318   :  { %6681 = vmatmul.mubr.f32.gmra.mrb[14].mxu0 %v3343_v49 }
 0x319   :  { %6691 = vmatprep.mubr.f32.mxu0 %v8169_v54 }
 0x31c   :  { %6692 = vmatmul.mubr.f32.vlgmr.msra.gmra.mrb[8].mxu0 %v8166_v28 }
 0x31d   :  { %6694 = vmatprep.mubr.f32.mxu0 %v8195_v13  ;;  %7030 = vmatpush3.bf16.msra.mxu0 %v8137_v11  ;;  %v6032_v11 = vld [vmem:[%s8421_s5] ss:$0 sm:$0xff]  ;;  %s7460_s5 = smov [#allocation5]  }
 0x31e   :  { %7032 = vmatprep.subr.bf16.mxu0 %v8141_v55  ;;  %s6017_s14 = sshll.u32 %s7460_s5, 4  ;;  %s6018_s14 = int_to_ptr.vmem [resolvable:$true] %s6017_s14 }
 0x31f   :  { %s7430_s15 = scalar_lea.vmem %s6018_s14, 1024  ;;  %p7435_p9 = scmp.lt.s32.totalorder %s6018_s14, %s6018_s14 }
 0x320   :  { %6695 = vmatmul.mubr.f32.gmra.mrb[10].mxu0 %v8193_v31  ;;  %p7431_p8 = scmp.ne.s32.totalorder %s6018_s14, %s7430_s15  ;;  %p7436_p10 = scmp.lt.s32.totalorder %s7430_s15, %s7430_s15 }
 0x321   :  { %6697 = vmatprep.mubr.f32.mxu0 %v8219_v23  ;;  %7034 = vmatpush3.bf16.msra.mxu0 %v8141_v55 }
 0x322   :  { %p7437_p11 = por %p7436_p10, %p7435_p9 }
 0x324   :  { %6698 = vmatmul.mubr.f32.gmra.mrb[12].mxu0 %v8217_v57  ;;  %p7438_p12 = pnand %p7437_p11, %p7431_p8 }
 0x325   :  { %6700 = vmatprep.mubr.f32.mxu0 %v8231_v42 }
 0x328   :  { %6701 = vmatmul.mubr.f32.gmra.mrb[14].mxu0 %v8229_v30 }
 0x329   :  { %6711 = vmatprep.mubr.f32.mxu0 %v8169_v54 }
 0x32c   :  { %6712 = vmatmul.mubr.f32.vlgmr.msra.gmra.mrb[8].mxu0 %v8166_v28 }
 0x32d   :  { %6714 = vmatprep.mubr.f32.mxu0 %v8195_v13 }
 0x330   :  { %6715 = vmatmul.mubr.f32.gmra.mrb[10].mxu0 %v8193_v31 }
 0x331   :  { %6717 = vmatprep.mubr.f32.mxu0 %v8219_v23 }
 0x334   :  { %6718 = vmatmul.mubr.f32.gmra.mrb[12].mxu0 %v8217_v57 }
 0x335   :  { %6720 = vmatprep.mubr.f32.mxu0 %v8231_v42 }
 0x338   :  { %6721 = vmatmul.mubr.f32.gmra.mrb[14].mxu0 %v8229_v30 }
 0x3ff   :  { %v6713_v55 = vpop.f32.mrb[8].mxu0 }
 0x400   :  { %v7139_v54 = vadd.f32 %v6713_v55, %v6032_v11  ;;  %v3942_v8 = vpop.f32.mrb[9].mxu0 }
 0x401   :  { %v7140_v28 = vadd.f32 %v6032_v11, %v3942_v8 }
 0x402   :  { %v3992_v52 = vand.u32 4294901760, %v7139_v54 }
 0x403   :  { %v3989_v24 = vand.u32 4294901760, %v7140_v28  ;;  %v6716_v13 = vpop.f32.mrb[10].mxu0 }
 0x404   :  { %v4084_v31 = vsub.f32 %v7139_v54, %v3992_v52  ;;  %v7141_v36 = vadd.f32 %v6716_v13, %v6032_v11  ;;  %v3954_v37 = vpop.f32.mrb[11].mxu0  ;;  %v8433_v54 = vld [vmem:[#allocation8_spill] sm:$0xff] }
 0x405   :  { %v8290_v48 = vpack.c.bf16 %v3992_v52, %v3989_v24  ;;  %v4077_v63 = vsub.f32 %v7140_v28, %v3989_v24  ;;  %v7142_v42 = vadd.f32 %v6032_v11, %v3954_v37 }
 0x406   :  { %v4085_v57 = vand.u32 4294901760, %v4084_v31  ;;  %v4494_v30 = vand.u32 4294901760, %v7141_v36 }
 0x407   :  { %v4078_v23 = vand.u32 4294901760, %v4077_v63  ;;  %v4491_v60 = vand.u32 4294901760, %v7142_v42  ;;  %v6719_v14 = vpop.f32.mrb[12].mxu0  ;;  %7036 = vmatprep.subr.bf16.mxu1 %v8290_v48  ;;  %v7043_v39 = vpack.c.bf16 %v4084_v31, %v4077_v63 }
 0x408   :  { %v4586_v45 = vsub.f32 %v7141_v36, %v4494_v30  ;;  %v7143_v26 = vadd.f32 %v6719_v14, %v6032_v11  ;;  %v3966_v53 = vpop.f32.mrb[13].mxu0  ;;  %7038 = vmatpush3.bf16.msra.mxu1 %v8290_v48  ;;  %v4086_v40 = vsub.f32 %v4084_v31, %v4085_v57 }
 0x409   :  { %v8294_v5 = vpack.c.bf16 %v4494_v30, %v4491_v60  ;;  %v4579_v49 = vsub.f32 %v7142_v42, %v4491_v60  ;;  %v7144_v44 = vadd.f32 %v6032_v11, %v3966_v53  ;;  %v4079_v4 = vsub.f32 %v4077_v63, %v4078_v23 }
 0x40a   :  { %v4587_v7 = vand.u32 4294901760, %v4586_v45  ;;  %v4996_v6 = vand.u32 4294901760, %v7143_v26  ;;  %v4087_v33 = vand.u32 4294901760, %v4086_v40  ;;  %v7051_v20 = vpack.c.bf16 %v4085_v57, %v4078_v23 }
 0x40b   :  { %v4580_v58 = vand.u32 4294901760, %v4579_v49  ;;  %v4993_v2 = vand.u32 4294901760, %v7144_v44  ;;  %v6722_v55 = vpop.f32.mrb[14].mxu0  ;;  %6728 = vmatmul.mubr.f32.vlgmr.msra.gmra.mrb[8].mxu1 %v8433_v54  ;;  %v4080_v8 = vand.u32 4294901760, %v4079_v4  ;;  %v8297_v28 = vpack.c.bf16 %v4586_v45, %v4579_v49 }
 0x40c   :  { %v5088_v52 = vsub.f32 %v7143_v26, %v4996_v6  ;;  %v7145_v24 = vadd.f32 %v6722_v55, %v6032_v11  ;;  %v3978_v13 = vpop.f32.mrb[15].mxu0  ;;  %6734 = vmatprep.mubr.f32.mxu1 %v7838_v0  ;;  %v4588_v31 = vsub.f32 %v4586_v45, %v4587_v7 }
 0x40d   :  { %v8300_v36 = vpack.c.bf16 %v4996_v6, %v4993_v2  ;;  %v5081_v37 = vsub.f32 %v7144_v44, %v4993_v2  ;;  %v7146_v63 = vadd.f32 %v6032_v11, %v3978_v13  ;;  %v7039_v42 = vpack.c.bf16 %v4087_v33, %v4080_v8 }
 0x40e   :  { %v5089_v57 = vand.u32 4294901760, %v5088_v52  ;;  %v5498_v30 = vand.u32 4294901760, %v7145_v24  ;;  %v4581_v23 = vsub.f32 %v4579_v49, %v4580_v58  ;;  %v4589_v60 = vand.u32 4294901760, %v4588_v31 }
 0x40f   :  { %v5082_v14 = vand.u32 4294901760, %v5081_v37  ;;  %v5495_v53 = vand.u32 4294901760, %v7146_v63  ;;  %7040 = vmatprep.subr.bf16.mxu1 %v7039_v42  ;;  %v7075_v40 = vpack.c.bf16 %v4587_v7, %v4580_v58  ;;  %v8302_v4 = vpack.c.bf16 %v5088_v52, %v5081_v37 }
 0x410   :  { %v5590_v26 = vsub.f32 %v7145_v24, %v5498_v30  ;;  %7042 = vmatpush3.bf16.msra.mxu1 %v7039_v42  ;;  %v4582_v55 = vand.u32 4294901760, %v4581_v23  ;;  %v5090_v54 = vsub.f32 %v5088_v52, %v5089_v57 }
 0x411   :  { %v8304_v45 = vpack.c.bf16 %v5498_v30, %v5495_v53  ;;  %v5583_v6 = vsub.f32 %v7146_v63, %v5495_v53  ;;  %7044 = vmatprep.subr.bf16.mxu1 %v7043_v39  ;;  %v5083_v11 = vsub.f32 %v5081_v37, %v5082_v14  ;;  %v8306_v44 = vpack.c.bf16 %v5089_v57, %v5082_v14 }
 0x412   :  { %v5591_v33 = vand.u32 4294901760, %v5590_v26  ;;  %v7063_v49 = vpack.c.bf16 %v4589_v60, %v4582_v55  ;;  %v5091_v2 = vand.u32 4294901760, %v5090_v54 }
 0x413   :  { %v5584_v8 = vand.u32 4294901760, %v5583_v6  ;;  %6735 = vmatmul.mubr.f32.vlgmr.msra.gmra.mrb[8].mxu1 %v7861_v29  ;;  %v5084_v7 = vand.u32 4294901760, %v5083_v11  ;;  %v8309_v58 = vpack.c.bf16 %v5590_v26, %v5583_v6 }
 0x414   :  { %7046 = vmatpush3.bf16.msra.mxu1 %v7043_v39  ;;  %6741 = vmatprep.mubr.f32.mxu1 %v7841_v25  ;;  %v5592_v52 = vsub.f32 %v5590_v26, %v5591_v33 }
 0x415   :  { %7048 = vmatprep.subr.bf16.mxu1 %v8290_v48  ;;  %v7087_v24 = vpack.c.bf16 %v5091_v2, %v5084_v7  ;;  %v5585_v13 = vsub.f32 %v5583_v6, %v5584_v8  ;;  %v8313_v31 = vpack.c.bf16 %v5591_v33, %v5584_v8 }
 0x416   :  { %v5593_v37 = vand.u32 4294901760, %v5592_v52 }
 0x417   :  { %v5586_v63 = vand.u32 4294901760, %v5585_v13 }
 0x419   :  { %v8315_v42 = vpack.c.bf16 %v5593_v37, %v5586_v63 }
 0x41b   :  { %6742 = vmatmul.mubr.f32.vlgmr.msra.gmra.mrb[8].mxu1 %v7864_v43 }
 0x41c   :  { %7050 = vmatpush3.bf16.msra.mxu1 %v8290_v48  ;;  %6748 = vmatprep.mubr.f32.mxu1 %v7844_v18 }
 0x41d   :  { %7052 = vmatprep.subr.bf16.mxu1 %v7051_v20 }
 0x423   :  { %6749 = vmatmul.mubr.f32.vlgmr.msra.gmra.mrb[8].mxu1 %v7874_v21 }
 0x424   :  { %7054 = vmatpush3.bf16.msra.mxu1 %v7051_v20  ;;  %6755 = vmatprep.mubr.f32.mxu1 %v7838_v0 }
 0x425   :  { %7056 = vmatprep.subr.bf16.mxu1 %v8290_v48 }
 0x42b   :  { %6756 = vmatmul.mubr.f32.vlgmr.msra.gmra.mrb[8].mxu1 %v7861_v29 }
 0x42c   :  { %7058 = vmatpush3.bf16.msra.mxu1 %v8290_v48  ;;  %6762 = vmatprep.mubr.f32.mxu1 %v7838_v0 }
 0x42d   :  { %7060 = vmatprep.subr.bf16.mxu1 %v8294_v5 }
 0x433   :  { %6763 = vmatmul.mubr.f32.vlgmr.msra.gmra.mrb[8].mxu1 %v7861_v29 }
 0x434   :  { %7062 = vmatpush3.bf16.msra.mxu1 %v8294_v5  ;;  %6769 = vmatprep.mubr.f32.mxu1 %v7976_v9 }
 0x435   :  { %7064 = vmatprep.subr.bf16.mxu1 %v7063_v49 }
 0x437   :  { %6770 = vmatmul.mubr.f32.vlgmr.msra.gmra.mrb[10].mxu1 %v7984_v35 }
 0x438   :  { %7066 = vmatpush3.bf16.msra.mxu1 %v7063_v49  ;;  %6776 = vmatprep.mubr.f32.mxu1 %v7947_v47 }
 0x439   :  { %7068 = vmatprep.subr.bf16.mxu1 %v8297_v28 }
 0x43f   :  { %6777 = vmatmul.mubr.f32.vlgmr.msra.gmra.mrb[10].mxu1 %v7954_v34 }
 0x440   :  { %7070 = vmatpush3.bf16.msra.mxu1 %v8297_v28  ;;  %6783 = vmatprep.mubr.f32.mxu1 %v7957_v3 }
 0x441   :  { %7072 = vmatprep.subr.bf16.mxu1 %v8294_v5 }
 0x447   :  { %6784 = vmatmul.mubr.f32.vlgmr.msra.gmra.mrb[10].mxu1 %v7960_v10 }
 0x448   :  { %7074 = vmatpush3.bf16.msra.mxu1 %v8294_v5  ;;  %6790 = vmatprep.mubr.f32.mxu1 %v7963_v59 }
 0x449   :  { %7076 = vmatprep.subr.bf16.mxu1 %v7075_v40 }
 0x44f   :  { %6791 = vmatmul.mubr.f32.vlgmr.msra.gmra.mrb[10].mxu1 %v7970_v62 }
 0x450   :  { %7078 = vmatpush3.bf16.msra.mxu1 %v7075_v40  ;;  %6797 = vmatprep.mubr.f32.mxu1 %v7947_v47 }
 0x451   :  { %7080 = vmatprep.subr.bf16.mxu1 %v8294_v5 }
 0x457   :  { %6798 = vmatmul.mubr.f32.vlgmr.msra.gmra.mrb[10].mxu1 %v7954_v34 }
 0x458   :  { %7082 = vmatpush3.bf16.msra.mxu1 %v8294_v5  ;;  %6804 = vmatprep.mubr.f32.mxu1 %v7947_v47 }
 0x459   :  { %7084 = vmatprep.subr.bf16.mxu1 %v8300_v36 }
 0x45f   :  { %6805 = vmatmul.mubr.f32.vlgmr.msra.gmra.mrb[10].mxu1 %v7954_v34 }
 0x460   :  { %7086 = vmatpush3.bf16.msra.mxu1 %v8300_v36  ;;  %6811 = vmatprep.mubr.f32.mxu1 %v8044_v38 }
 0x461   :  { %7088 = vmatprep.subr.bf16.mxu1 %v7087_v24 }
 0x463   :  { %6812 = vmatmul.mubr.f32.vlgmr.msra.gmra.mrb[12].mxu1 %v8052_v15 }
 0x464   :  { %7090 = vmatpush3.bf16.msra.mxu1 %v7087_v24  ;;  %6818 = vmatprep.mubr.f32.mxu1 %v8015_v56 }
 0x465   :  { %7092 = vmatprep.subr.bf16.mxu1 %v8302_v4 }
 0x46b   :  { %6819 = vmatmul.mubr.f32.vlgmr.msra.gmra.mrb[12].mxu1 %v8022_v61 }
 0x46c   :  { %7094 = vmatpush3.bf16.msra.mxu1 %v8302_v4  ;;  %6825 = vmatprep.mubr.f32.mxu1 %v8025_v51 }
 0x46d   :  { %7096 = vmatprep.subr.bf16.mxu1 %v8300_v36 }
 0x473   :  { %6826 = vmatmul.mubr.f32.vlgmr.msra.gmra.mrb[12].mxu1 %v8028_v22 }
 0x474   :  { %7098 = vmatpush3.bf16.msra.mxu1 %v8300_v36  ;;  %6832 = vmatprep.mubr.f32.mxu1 %v8031_v46 }
 0x475   :  { %7100 = vmatprep.subr.bf16.mxu1 %v8306_v44 }
 0x47b   :  { %6833 = vmatmul.mubr.f32.vlgmr.msra.gmra.mrb[12].mxu1 %v8038_v16 }
 0x47c   :  { %7102 = vmatpush3.bf16.msra.mxu1 %v8306_v44  ;;  %6839 = vmatprep.mubr.f32.mxu1 %v8015_v56 }
 0x47d   :  { %7104 = vmatprep.subr.bf16.mxu1 %v8300_v36 }
 0x483   :  { %6840 = vmatmul.mubr.f32.vlgmr.msra.gmra.mrb[12].mxu1 %v8022_v61 }
 0x484   :  { %7106 = vmatpush3.bf16.msra.mxu1 %v8300_v36  ;;  %6846 = vmatprep.mubr.f32.mxu1 %v8015_v56 }
 0x485   :  { %7108 = vmatprep.subr.bf16.mxu1 %v8304_v45 }
 0x48b   :  { %6847 = vmatmul.mubr.f32.vlgmr.msra.gmra.mrb[12].mxu1 %v8022_v61 }
 0x48c   :  { %7110 = vmatpush3.bf16.msra.mxu1 %v8304_v45  ;;  %6853 = vmatprep.mubr.f32.mxu1 %v8112_v41 }
 0x48d   :  { %7112 = vmatprep.subr.bf16.mxu1 %v8315_v42 }
 0x48f   :  { %6854 = vmatmul.mubr.f32.vlgmr.msra.gmra.mrb[14].mxu1 %v8118_v32 }
 0x490   :  { %7114 = vmatpush3.bf16.msra.mxu1 %v8315_v42  ;;  %6860 = vmatprep.mubr.f32.mxu1 %v8083_v17 }
 0x491   :  { %7116 = vmatprep.subr.bf16.mxu1 %v8309_v58 }
 0x497   :  { %6861 = vmatmul.mubr.f32.vlgmr.msra.gmra.mrb[14].mxu1 %v8090_v19 }
 0x498   :  { %7118 = vmatpush3.bf16.msra.mxu1 %v8309_v58  ;;  %6867 = vmatprep.mubr.f32.mxu1 %v8093_v1 }
 0x499   :  { %7120 = vmatprep.subr.bf16.mxu1 %v8304_v45 }
 0x49f   :  { %6868 = vmatmul.mubr.f32.vlgmr.msra.gmra.mrb[14].mxu1 %v8096_v12 }
 0x4a0   :  { %7122 = vmatpush3.bf16.msra.mxu1 %v8304_v45  ;;  %6874 = vmatprep.mubr.f32.mxu1 %v8099_v50 }
 0x4a1   :  { %7124 = vmatprep.subr.bf16.mxu1 %v8313_v31 }
 0x4a7   :  { %6875 = vmatmul.mubr.f32.vlgmr.msra.gmra.mrb[14].mxu1 %v8106_v27 }
 0x4a8   :  { %7126 = vmatpush3.bf16.msra.mxu1 %v8313_v31  ;;  %6881 = vmatprep.mubr.f32.mxu1 %v8083_v17 }
 0x4a9   :  { %7128 = vmatprep.subr.bf16.mxu1 %v8304_v45 }
 0x4af   :  { %6882 = vmatmul.mubr.f32.vlgmr.msra.gmra.mrb[14].mxu1 %v8090_v19 }
 0x4b0   :  { %7130 = vmatpush3.bf16.msra.mxu1 %v8304_v45  ;;  %6888 = vmatprep.mubr.f32.mxu1 %v8083_v17 }
 0x4b7   :  { %6889 = vmatmul.mubr.f32.vlgmr.msra.gmra.mrb[14].mxu1 %v8090_v19 }
 0x506   :  { %v6764_v0 = vpop.f32.mrb[8].mxu1 }
 0x507   :  { %7392 = vtanh.f32 %v6764_v0  ;;  %v4480_v25 = vpop.f32.mrb[9].mxu1 }
 0x508   :  { %7394 = vtanh.f32 %v4480_v25 }
 0x511   :  { %v7393_v18 = vpop.eup %7392 }
 0x512   :  { %v7395_v29 = vpop.eup %7394  ;;  %6005 = vst.msk [vmem:[#allocation5 + $0x8] sm:$0xff] %vm3177_vm4, %v7393_v18 }
 0x513   :  { %6004 = vst.msk [vmem:[#allocation5] sm:$0xff] %vm3177_vm4, %v7395_v29 }
 0x532   :  { %v6806_v43 = vpop.f32.mrb[10].mxu1 }
 0x533   :  { %7396 = vtanh.f32 %v6806_v43  ;;  %v4982_v21 = vpop.f32.mrb[11].mxu1 }
 0x534   :  { %7398 = vtanh.f32 %v4982_v21 }
 0x53d   :  { %v7397_v47 = vpop.eup %7396 }
 0x53e   :  { %v7399_v34 = vpop.eup %7398  ;;  %6007 = vst.msk [vmem:[#allocation5 + $0x18] sm:$0xff] %vm3177_vm4, %v7397_v47 }
 0x53f   :  { %6006 = vst.msk [vmem:[#allocation5 + $0x10] sm:$0xff] %vm3177_vm4, %v7399_v34 }
 0x55e   :  { %v6848_v3 = vpop.f32.mrb[12].mxu1 }
 0x55f   :  { %7400 = vtanh.f32 %v6848_v3  ;;  %v5484_v10 = vpop.f32.mrb[13].mxu1 }
 0x560   :  { %7402 = vtanh.f32 %v5484_v10 }
 0x569   :  { %v7401_v59 = vpop.eup %7400 }
 0x56a   :  { %v7403_v62 = vpop.eup %7402  ;;  %6009 = vst.msk [vmem:[#allocation5 + $0x28] sm:$0xff] %vm3177_vm4, %v7401_v59 }
 0x56b   :  { %6008 = vst.msk [vmem:[#allocation5 + $0x20] sm:$0xff] %vm3177_vm4, %v7403_v62 }
 0x58a   :  { %v6890_v9 = vpop.f32.mrb[14].mxu1 }
 0x58b   :  { %7404 = vtanh.f32 %v6890_v9  ;;  %v5986_v35 = vpop.f32.mrb[15].mxu1 }
 0x58c   :  { %7406 = vtanh.f32 %v5986_v35 }
 0x595   :  { %v7405_v56 = vpop.eup %7404 }
 0x596   :  { %v7407_v61 = vpop.eup %7406  ;;  %6011 = vst.msk [vmem:[#allocation5 + $0x38] sm:$0xff] %vm3177_vm4, %v7405_v56 }
 0x597   :  { %6010 = vst.msk [vmem:[#allocation5 + $0x30] sm:$0xff] %vm3177_vm4, %v7407_v61 }
 0x598   :  { %7441 = shalt.err (!%p7438_p12)
}
 0x599   :  { %s7442_s17 = scalar_lea.hbm %s8422_s6, 1024 }
 0x59a   :  { %p7443_p13 = scmp.ne.s32.totalorder %s8422_s6, %s7442_s17  ;;  %p7446_p0 = scmp.lt.u32.totalorder %s7442_s17, %s8422_s6 }
 0x59c   :  { %p7448_p1 = pnand %p7446_p0, %p7443_p13 }
 0x59e   :  { %7451 = shalt.err (!%p7448_p1)
}
 0x59f   :  { %6023 = dma.vmem_to_hbm [thread:$0]  %s6018_s14, 1024, %s8422_s6, [#allocation4], %s7457_s7, %s7457_s7, %s7458_s8  }
 0x5a0   :  { %7454 = dma.done.wait [#allocation4], 1024  }
 0x5a1   :  { %7455 = vsyncadd [#allocation4], 4294966272 }
 0x5a2   :  { %6027 = vsyncpa [#allocation3], 1 }
 0x5a3   :  { %6028 = vsyncpa [#allocation4], 1 }

</bundles_post_ra>
